<compile_context>
chip_gen: v7x
topology: tpu7x:2x2x1
jax: 0.10.0
libtpu: 0.0.40
codegen_flags: <defaults>
</compile_context>

<pallas_src>
import functools
import math

import jax
import jax.numpy as jnp
from jax import lax
from jax.experimental import pallas as pl
from jax.experimental.pallas import tpu as pltpu


# Contract last dim of both operands: native q @ k^T pattern (no k transpose).
_CONTRACT_LAST = (((1,), (1,)), ((), ()))


@functools.lru_cache(maxsize=None)
def _vmem_caps():
    """(working-set budget, scoped vmem limit) derived from the TPU generation."""
    try:
        phys = int(pltpu.get_tpu_info().vmem_capacity_bytes)
    except Exception:
        phys = 64 * 1024 * 1024  # conservative fallback (v7x-sized)
    limit = min(phys // 2, 64 * 1024 * 1024)
    budget = min(phys // 8, 16 * 1024 * 1024)
    return budget, limit


def _pick_tile_m(m, per_row_bytes, budget):
    """Largest tile from a fixed ladder that divides m and fits the VMEM budget."""
    cap = max(8, budget // max(per_row_bytes, 1))
    for t in (2048, 1024, 512, 256, 128, 64, 32, 16, 8):
        if t <= cap and m % t == 0:
            return t
    return m  # single full block (legal: equals the array dim)


def _pick_seq_tile(s, d, dsize, budget):
    # per-step working set ~ 2x(q,k,v,o) blocks + f32 acc + f32 score temporaries
    for t in (512, 256, 128):
        if s % t == 0 and (8 * t * d * dsize + 4 * t * d + 12 * t * t) <= budget:
            return t
    return s  # whole sequence as one tile (small / irregular S)


# ----------------------------------------------------------------------------
# Projection kernels (plain (M,K)x(K,N) matmuls; weights pre-transposed)
# ----------------------------------------------------------------------------
def _linear_kernel(x_ref, w_ref, b_ref, o_ref):
    o_ref[...] = (jnp.dot(x_ref[...], w_ref[...], preferred_element_type=jnp.float32)
                  + b_ref[...]).astype(o_ref.dtype)


def _qkv_self_kernel(x_ref, w_ref, b_ref, q_ref, k_ref, v_ref):
    # One N=3D matmul; split into three lane-dense (tm, D) stores.
    d = q_ref.shape[-1]
    y = jnp.dot(x_ref[...], w_ref[...], preferred_element_type=jnp.float32) + b_ref[...]
    q_ref[...] = y[:, :d].astype(q_ref.dtype)
    k_ref[...] = y[:, d:2 * d].astype(k_ref.dtype)
    v_ref[...] = y[:, 2 * d:].astype(v_ref.dtype)


def _qkv_cross_kernel(xq_ref, xk_ref, xv_ref, wq_ref, wk_ref, wv_ref,
                      bq_ref, bk_ref, bv_ref, q_ref, k_ref, v_ref):
    q_ref[...] = (jnp.dot(xq_ref[...], wq_ref[...], preferred_element_type=jnp.float32)
                  + bq_ref[...]).astype(q_ref.dtype)
    k_ref[...] = (jnp.dot(xk_ref[...], wk_ref[...], preferred_element_type=jnp.float32)
                  + bk_ref[...]).astype(k_ref.dtype)
    v_ref[...] = (jnp.dot(xv_ref[...], wv_ref[...], preferred_element_type=jnp.float32)
                  + bv_ref[...]).astype(v_ref.dtype)


def linear(x2d, w_t, b):
    m, d_in = x2d.shape
    d_out = w_t.shape[1]
    budget, vmem_limit = _vmem_caps()
    dsize = x2d.dtype.itemsize
    weight_bytes = (d_in * d_out + d_out) * w_t.dtype.itemsize
    per_row = 2 * (d_in + d_out) * dsize
    tm = _pick_tile_m(m, per_row, budget - weight_bytes)
    return pl.pallas_call(
        _linear_kernel,
        out_shape=jax.ShapeDtypeStruct((m, d_out), x2d.dtype),
        grid=(m // tm,),
        in_specs=[pl.BlockSpec((tm, d_in), lambda i: (i, 0)),
                  pl.BlockSpec((d_in, d_out), lambda i: (0, 0)),
                  pl.BlockSpec((1, d_out), lambda i: (0, 0))],
        out_specs=pl.BlockSpec((tm, d_out), lambda i: (i, 0)),
        compiler_params=pltpu.CompilerParams(
            dimension_semantics=("parallel",), vmem_limit_bytes=vmem_limit),
    )(x2d, w_t, b.reshape(1, d_out))


def qkv_projection_self(x2d, w_qkv_t, b_qkv):
    """Self-attention fast path: one activation stream, one (D, 3D) matmul."""
    m, d_in = x2d.shape
    d3 = w_qkv_t.shape[1]
    d = d3 // 3
    budget, vmem_limit = _vmem_caps()
    dsize = x2d.dtype.itemsize
    weight_bytes = (d_in * d3 + d3) * w_qkv_t.dtype.itemsize
    per_row = 2 * (d_in + d3) * dsize
    tm = _pick_tile_m(m, per_row, budget - weight_bytes)
    out_sd = jax.ShapeDtypeStruct((m, d), x2d.dtype)
    o_spec = pl.BlockSpec((tm, d), lambda i: (i, 0))
    return pl.pallas_call(
        _qkv_self_kernel,
        out_shape=(out_sd, out_sd, out_sd),
        grid=(m // tm,),
        in_specs=[pl.BlockSpec((tm, d_in), lambda i: (i, 0)),
                  pl.BlockSpec((d_in, d3), lambda i: (0, 0)),
                  pl.BlockSpec((1, d3), lambda i: (0, 0))],
        out_specs=(o_spec, o_spec, o_spec),
        compiler_params=pltpu.CompilerParams(
            dimension_semantics=("parallel",), vmem_limit_bytes=vmem_limit),
    )(x2d, w_qkv_t, b_qkv.reshape(1, d3))


def qkv_projection_cross(xq, xk, xv, wq_t, bq, wk_t, bk, wv_t, bv):
    """General path: three activation streams, one pallas_call, three matmuls."""
    m, d_in = xq.shape
    d_out = wq_t.shape[1]
    budget, vmem_limit = _vmem_caps()
    dsize = xq.dtype.itemsize
    weight_bytes = 3 * (d_in * d_out + d_out) * wq_t.dtype.itemsize
    per_row = 2 * 3 * (d_in + d_out) * dsize
    tm = _pick_tile_m(m, per_row, budget - weight_bytes)

    x_spec = pl.BlockSpec((tm, d_in), lambda i: (i, 0))
    w_spec = pl.BlockSpec((d_in, d_out), lambda i: (0, 0))
    b_spec = pl.BlockSpec((1, d_out), lambda i: (0, 0))
    o_spec = pl.BlockSpec((tm, d_out), lambda i: (i, 0))
    out_sd = jax.ShapeDtypeStruct((m, d_out), xq.dtype)
    return pl.pallas_call(
        _qkv_cross_kernel,
        out_shape=(out_sd, out_sd, out_sd),
        grid=(m // tm,),
        in_specs=[x_spec, x_spec, x_spec, w_spec, w_spec, w_spec,
                  b_spec, b_spec, b_spec],
        out_specs=(o_spec, o_spec, o_spec),
        compiler_params=pltpu.CompilerParams(
            dimension_semantics=("parallel",), vmem_limit_bytes=vmem_limit),
    )(xq, xk, xv, wq_t, wk_t, wv_t,
      bq.reshape(1, d_out), bk.reshape(1, d_out), bv.reshape(1, d_out))


# ----------------------------------------------------------------------------
# Flash-style attention: grid (B, Sq/tq, Sk/tk), heads handled in-kernel,
# online softmax accumulated in VMEM scratch, one lane-dense output store.
# ----------------------------------------------------------------------------
def _attn_kernel(q_ref, k_ref, v_ref, mask_ref, o_ref, acc_ref, m_ref, l_ref, *, h):
    ki = pl.program_id(2)
    nk = pl.num_programs(2)
    D = q_ref.shape[2]
    d_k = D // h
    scale = jnp.float32(1.0 / math.sqrt(d_k))
    neg = jnp.float32(-1e9)

    @pl.when(ki == 0)
    def _():
        m_ref[...] = jnp.full(m_ref.shape, -jnp.inf, jnp.float32)
        l_ref[...] = jnp.zeros(l_ref.shape, jnp.float32)
        acc_ref[...] = jnp.zeros(acc_ref.shape, jnp.float32)

    keep = mask_ref[0, 0] != 0  # (1 or tq, tk); broadcasts over heads / rows

    # TODO(synk): for large h switch this static unroll to lax.fori_loop with
    # pl.ds(hd * d_k, d_k) + pl.multiple_of; scratch writes already bound the
    # per-head live ranges.
    for hd in range(h):
        sl = slice(hd * d_k, (hd + 1) * d_k)
        qh = q_ref[0, :, sl]            # (tq, d_k), input dtype (no f32 upcast)
        kh = k_ref[0, :, sl]            # (tk, d_k)
        vh = v_ref[0, :, sl]            # (tk, d_k)

        # scores = qh @ kh^T, f32 accumulation on the MXU, softmax math in f32
        s = lax.dot_general(qh, kh, _CONTRACT_LAST,
                            preferred_element_type=jnp.float32) * scale  # (tq, tk)
        s = jnp.where(keep, s, neg)

        m_prev = m_ref[:, hd:hd + 1]                                     # (tq, 1)
        m_new = jnp.maximum(m_prev, jnp.max(s, axis=-1, keepdims=True))
        alpha = jnp.exp(m_prev - m_new)
        p = jnp.exp(s - m_new)
        l_ref[:, hd:hd + 1] = alpha * l_ref[:, hd:hd + 1] + jnp.sum(p, -1, keepdims=True)
        # Dropout(p=0.0 / eval) on p is identity.
        acc_ref[:, sl] = alpha * acc_ref[:, sl] + jnp.dot(
            p.astype(vh.dtype), vh, preferred_element_type=jnp.float32)
        m_ref[:, hd:hd + 1] = m_new

    @pl.when(ki == nk - 1)
    def _():
        inv_l = pl.reciprocal(l_ref[...], approx=True)   # (tq, h), EUP slot
        for hd in range(h):
            sl = slice(hd * d_k, (hd + 1) * d_k)
            acc_ref[:, sl] = acc_ref[:, sl] * inv_l[:, hd:hd + 1]
        o_ref[0] = acc_ref[...].astype(o_ref.dtype)      # one lane-dense (tq, D) store


def attention(q, k, v, mask, h):
    B, Sq, D = q.shape
    Sk = k.shape[1]
    assert D % h == 0, "d_model must be divisible by h"
    budget, vmem_limit = _vmem_caps()
    dsize = q.dtype.itemsize

    # TODO(synk): for masks statically known to be causal, generate them in-kernel
    # with broadcasted_iota instead of DMAing; as a runtime module input we can only
    # shrink the DMA to int8 here.
    if mask is None:
        mask = jnp.ones((1, 1, 1, Sk), jnp.int8)
    mask_i8 = (mask != 0).astype(jnp.int8)
    mb, mh, mq, mk = mask_i8.shape
    assert mh == 1, "mask head dim must be 1 (broadcast over heads)"
    assert mk == Sk, "mask key dim must match key sequence length"

    tq = _pick_seq_tile(Sq, D, dsize, budget)
    tk = _pick_seq_tile(Sk, D, dsize, budget)
    mq_blk = tq if mq == Sq else 1
    mask_map = lambda b, qi, ki: (b if mb > 1 else 0, 0, qi if mq > 1 else 0, ki)

    kernel = functools.partial(_attn_kernel, h=h)
    return pl.pallas_call(
        kernel,
        out_shape=jax.ShapeDtypeStruct((B, Sq, D), q.dtype),
        grid=(B, Sq // tq, Sk // tk),
        in_specs=[pl.BlockSpec((1, tq, D), lambda b, qi, ki: (b, qi, 0)),
                  pl.BlockSpec((1, tk, D), lambda b, qi, ki: (b, ki, 0)),
                  pl.BlockSpec((1, tk, D), lambda b, qi, ki: (b, ki, 0)),
                  pl.BlockSpec((1, 1, mq_blk, tk), mask_map)],
        out_specs=pl.BlockSpec((1, tq, D), lambda b, qi, ki: (b, qi, 0)),
        scratch_shapes=[pltpu.VMEM((tq, D), jnp.float32),   # per-head output accumulator
                        pltpu.VMEM((tq, h), jnp.float32),   # running max (heads on lanes)
                        pltpu.VMEM((tq, h), jnp.float32)],  # running denominator
        compiler_params=pltpu.CompilerParams(
            dimension_semantics=("parallel", "parallel", "arbitrary"),
            vmem_limit_bytes=vmem_limit),
    )(q, k, v, mask_i8)


# ----------------------------------------------------------------------------
# Full MultiHeadAttentionBlock forward
# ----------------------------------------------------------------------------
@functools.partial(jax.jit, static_argnames=("h",))
def _mha_forward_self(params, x, mask, *, h):
    B, S, D = x.shape
    # Fused (3D, D) weight, transposed once at trace time -> plain (M,K)x(K,3N) matmul.
    w_qkv_t = jnp.concatenate(
        [params["wq_w"], params["wk_w"], params["wv_w"]], axis=0).T        # (D, 3D)
    b_qkv = jnp.concatenate(
        [params["wq_b"], params["wk_b"], params["wv_b"]], axis=0)          # (3D,)
    qp, kp, vp = qkv_projection_self(x.reshape(B * S, D), w_qkv_t, b_qkv)
    a = attention(qp.reshape(B, S, D), kp.reshape(B, S, D), vp.reshape(B, S, D), mask, h)
    return linear(a.reshape(B * S, D), params["wo_w"].T, params["wo_b"]).reshape(B, S, D)


@functools.partial(jax.jit, static_argnames=("h",))
def _mha_forward_cross(params, q, k, v, mask, *, h):
    B, Sq, D = q.shape
    Sk = k.shape[1]
    wq_t, wk_t, wv_t = params["wq_w"].T, params["wk_w"].T, params["wv_w"].T
    if q.shape == k.shape == v.shape:
        qp, kp, vp = qkv_projection_cross(
            q.reshape(B * Sq, D), k.reshape(B * Sk, D), v.reshape(B * Sk, D),
            wq_t, params["wq_b"], wk_t, params["wk_b"], wv_t, params["wv_b"])
    else:
        # Differing source/target lengths: project each stream separately.
        qp = linear(q.reshape(B * Sq, D), wq_t, params["wq_b"])
        kp = linear(k.reshape(B * Sk, D), wk_t, params["wk_b"])
        vp = linear(v.reshape(B * Sk, D), wv_t, params["wv_b"])
    a = attention(qp.reshape(B, Sq, D), kp.reshape(B, Sk, D), vp.reshape(B, Sk, D), mask, h)
    return linear(a.reshape(B * Sq, D), params["wo_w"].T, params["wo_b"]).reshape(B, Sq, D)


def mha_forward(params, q, k, v, mask, h):
    if (q is k) and (k is v):
        return _mha_forward_self(params, q, mask, h=h)
    return _mha_forward_cross(params, q, k, v, mask, h=h)


# ----------------------------------------------------------------------------
# Pure-JAX reference (sanity check)
# ----------------------------------------------------------------------------
def mha_reference(params, q, k, v, mask, h):
    B, Sq, D = q.shape
    Sk = k.shape[1]
    d_k = D // h

    def lin(x, w, b):
        return x @ w.T + b

    query = lin(q, params["wq_w"], params["wq_b"]).reshape(B, Sq, h, d_k).transpose(0, 2, 1, 3)
    key = lin(k, params["wk_w"], params["wk_b"]).reshape(B, Sk, h, d_k).transpose(0, 2, 1, 3)
    value = lin(v, params["wv_w"], params["wv_b"]).reshape(B, Sk, h, d_k).transpose(0, 2, 1, 3)

    scores = jnp.einsum("bhqd,bhkd->bhqk", query, key) / math.sqrt(d_k)
    scores = jnp.where(mask == 0, -1e9, scores)
    p = jax.nn.softmax(scores, axis=-1)
    x = jnp.einsum("bhqk,bhkd->bhqd", p, value)
    x = x.transpose(0, 2, 1, 3).reshape(B, Sq, D)
    return lin(x, params["wo_w"], params["wo_b"])


if __name__ == "__main__":
    B, S, D, H = 2, 8, 32, 4
    dtype = jnp.float32

    key = jax.random.PRNGKey(0)
    ks = jax.random.split(key, 12)

    params = {
        "wq_w": 0.1 * jax.random.normal(ks[0], (D, D), dtype),
        "wq_b": 0.1 * jax.random.normal(ks[1], (D,), dtype),
        "wk_w": 0.1 * jax.random.normal(ks[2], (D, D), dtype),
        "wk_b": 0.1 * jax.random.normal(ks[3], (D,), dtype),
        "wv_w": 0.1 * jax.random.normal(ks[4], (D, D), dtype),
        "wv_b": 0.1 * jax.random.normal(ks[5], (D,), dtype),
        "wo_w": 0.1 * jax.random.normal(ks[6], (D, D), dtype),
        "wo_b": 0.1 * jax.random.normal(ks[7], (D,), dtype),
    }

    q_in = jax.random.normal(ks[8], (B, S, D), dtype)
    k_in = jax.random.normal(ks[9], (B, S, D), dtype)
    v_in = jax.random.normal(ks[10], (B, S, D), dtype)

    # Causal mask, shape (B, 1, S, S); 0 => masked position
    causal = jnp.tril(jnp.ones((S, S), jnp.int32))
    mask = jnp.broadcast_to(causal, (B, 1, S, S))

    # Cross-attention style call (q, k, v distinct)
    out = mha_forward(params, q_in, k_in, v_in, mask, H)
    out = jax.block_until_ready(out)
    ref = mha_reference(params, q_in, k_in, v_in, mask, H)
    assert out.shape == (B, S, D)
    # tolerance loosened slightly for the approx (EUP) reciprocal in softmax
    assert jnp.allclose(out, ref, atol=2e-3, rtol=2e-3), float(jnp.max(jnp.abs(out - ref)))

    # Self-attention fast path (fused (D, 3D) weight, activation read once)
    out_self = mha_forward(params, q_in, q_in, q_in, mask, H)
    out_self = jax.block_until_ready(out_self)
    ref_self = mha_reference(params, q_in, q_in, q_in, mask, H)
    assert jnp.allclose(out_self, ref_self, atol=2e-3, rtol=2e-3), \
        float(jnp.max(jnp.abs(out_self - ref_self)))

    print("KERNEL_OK")
</pallas_src>

<mosaic_0001>
module attributes {stable_mosaic.version = 11 : i64} {
  func.func @_qkv_cross_kernel(%arg0: i32, %arg1: memref<16x32xf32, #tpu.memory_space<vmem>>, %arg2: memref<16x32xf32, #tpu.memory_space<vmem>>, %arg3: memref<16x32xf32, #tpu.memory_space<vmem>>, %arg4: memref<32x32xf32, #tpu.memory_space<vmem>>, %arg5: memref<32x32xf32, #tpu.memory_space<vmem>>, %arg6: memref<32x32xf32, #tpu.memory_space<vmem>>, %arg7: memref<1x32xf32, #tpu.memory_space<vmem>>, %arg8: memref<1x32xf32, #tpu.memory_space<vmem>>, %arg9: memref<1x32xf32, #tpu.memory_space<vmem>>, %arg10: memref<16x32xf32, #tpu.memory_space<vmem>>, %arg11: memref<16x32xf32, #tpu.memory_space<vmem>>, %arg12: memref<16x32xf32, #tpu.memory_space<vmem>>) attributes {dimension_semantics = [#tpu.dimension_semantics<parallel>], iteration_bounds = array<i64: 1>, scalar_prefetch = 0 : i64, scratch_operands = 0 : i64, tpu.core_type = #tpu.core_type<tc>, window_params = [{transform_indices = @transform_0, window_bounds = array<i64: 16, 32>}, {transform_indices = @transform_1, window_bounds = array<i64: 16, 32>}, {transform_indices = @transform_2, window_bounds = array<i64: 16, 32>}, {pipeline_mode = #tpu.pipeline_mode<synchronous>, transform_indices = @transform_3, window_bounds = array<i64: 32, 32>}, {pipeline_mode = #tpu.pipeline_mode<synchronous>, transform_indices = @transform_4, window_bounds = array<i64: 32, 32>}, {pipeline_mode = #tpu.pipeline_mode<synchronous>, transform_indices = @transform_5, window_bounds = array<i64: 32, 32>}, {pipeline_mode = #tpu.pipeline_mode<synchronous>, transform_indices = @transform_6, window_bounds = array<i64: 1, 32>}, {pipeline_mode = #tpu.pipeline_mode<synchronous>, transform_indices = @transform_7, window_bounds = array<i64: 1, 32>}, {pipeline_mode = #tpu.pipeline_mode<synchronous>, transform_indices = @transform_8, window_bounds = array<i64: 1, 32>}, {transform_indices = @transform_9, window_bounds = array<i64: 16, 32>}, {transform_indices = @transform_10, window_bounds = array<i64: 16, 32>}, {transform_indices = @transform_11, window_bounds = array<i64: 16, 32>}]} {
    %c0 = arith.constant 0 : index
    %c0_0 = arith.constant 0 : index
    %0 = vector.load %arg1[%c0, %c0_0] : memref<16x32xf32, #tpu.memory_space<vmem>>, vector<16x32xf32>
    %c0_1 = arith.constant 0 : index
    %c0_2 = arith.constant 0 : index
    %1 = vector.load %arg4[%c0_1, %c0_2] : memref<32x32xf32, #tpu.memory_space<vmem>>, vector<32x32xf32>
    %cst = arith.constant dense<0.000000e+00> : vector<16x32xf32>
    %2 = tpu.matmul %0, %1, %cst {dimension_numbers = #tpu.dot_dimension_numbers<[1], [0], [0], [1], [0, 0, 1, 1], [], []>} : vector<16x32xf32>, vector<32x32xf32>, vector<16x32xf32> -> vector<16x32xf32>
    %c0_3 = arith.constant 0 : index
    %c0_4 = arith.constant 0 : index
    %3 = vector.load %arg7[%c0_3, %c0_4] : memref<1x32xf32, #tpu.memory_space<vmem>>, vector<1x32xf32>
    %4 = vector.broadcast %3 : vector<1x32xf32> to vector<16x32xf32>
    %5 = arith.addf %2, %4 : vector<16x32xf32>
    %c0_5 = arith.constant 0 : index
    %c0_6 = arith.constant 0 : index
    %6 = vector.load %arg10[%c0_5, %c0_6] : memref<16x32xf32, #tpu.memory_space<vmem>>, vector<16x32xf32>
    tpu.vector_store %arg10[%c0_5, %c0_6], %5 {strides = array<i32>} : memref<16x32xf32, #tpu.memory_space<vmem>>, vector<16x32xf32>,
    %c0_7 = arith.constant 0 : index
    %c0_8 = arith.constant 0 : index
    %7 = vector.load %arg2[%c0_7, %c0_8] : memref<16x32xf32, #tpu.memory_space<vmem>>, vector<16x32xf32>
    %c0_9 = arith.constant 0 : index
    %c0_10 = arith.constant 0 : index
    %8 = vector.load %arg5[%c0_9, %c0_10] : memref<32x32xf32, #tpu.memory_space<vmem>>, vector<32x32xf32>
    %cst_11 = arith.constant dense<0.000000e+00> : vector<16x32xf32>
    %9 = tpu.matmul %7, %8, %cst_11 {dimension_numbers = #tpu.dot_dimension_numbers<[1], [0], [0], [1], [0, 0, 1, 1], [], []>} : vector<16x32xf32>, vector<32x32xf32>, vector<16x32xf32> -> vector<16x32xf32>
    %c0_12 = arith.constant 0 : index
    %c0_13 = arith.constant 0 : index
    %10 = vector.load %arg8[%c0_12, %c0_13] : memref<1x32xf32, #tpu.memory_space<vmem>>, vector<1x32xf32>
    %11 = vector.broadcast %10 : vector<1x32xf32> to vector<16x32xf32>
    %12 = arith.addf %9, %11 : vector<16x32xf32>
    %c0_14 = arith.constant 0 : index
    %c0_15 = arith.constant 0 : index
    %13 = vector.load %arg11[%c0_14, %c0_15] : memref<16x32xf32, #tpu.memory_space<vmem>>, vector<16x32xf32>
    tpu.vector_store %arg11[%c0_14, %c0_15], %12 {strides = array<i32>} : memref<16x32xf32, #tpu.memory_space<vmem>>, vector<16x32xf32>,
    %c0_16 = arith.constant 0 : index
    %c0_17 = arith.constant 0 : index
    %14 = vector.load %arg3[%c0_16, %c0_17] : memref<16x32xf32, #tpu.memory_space<vmem>>, vector<16x32xf32>
    %c0_18 = arith.constant 0 : index
    %c0_19 = arith.constant 0 : index
    %15 = vector.load %arg6[%c0_18, %c0_19] : memref<32x32xf32, #tpu.memory_space<vmem>>, vector<32x32xf32>
    %cst_20 = arith.constant dense<0.000000e+00> : vector<16x32xf32>
    %16 = tpu.matmul %14, %15, %cst_20 {dimension_numbers = #tpu.dot_dimension_numbers<[1], [0], [0], [1], [0, 0, 1, 1], [], []>} : vector<16x32xf32>, vector<32x32xf32>, vector<16x32xf32> -> vector<16x32xf32>
    %c0_21 = arith.constant 0 : index
    %c0_22 = arith.constant 0 : index
    %17 = vector.load %arg9[%c0_21, %c0_22] : memref<1x32xf32, #tpu.memory_space<vmem>>, vector<1x32xf32>
    %18 = vector.broadcast %17 : vector<1x32xf32> to vector<16x32xf32>
    %19 = arith.addf %16, %18 : vector<16x32xf32>
    %c0_23 = arith.constant 0 : index
    %c0_24 = arith.constant 0 : index
    %20 = vector.load %arg12[%c0_23, %c0_24] : memref<16x32xf32, #tpu.memory_space<vmem>>, vector<16x32xf32>
    tpu.vector_store %arg12[%c0_23, %c0_24], %19 {strides = array<i32>} : memref<16x32xf32, #tpu.memory_space<vmem>>, vector<16x32xf32>,
    return
  }
  func.func @transform_0(%arg0: i32) -> (i32, i32) {
    %c0_i32 = arith.constant 0 : i32
    %c0_i32_0 = arith.constant 0 : i32
    return %arg0, %c0_i32 : i32, i32
  }
  func.func @transform_1(%arg0: i32) -> (i32, i32) {
    %c0_i32 = arith.constant 0 : i32
    %c0_i32_0 = arith.constant 0 : i32
    return %arg0, %c0_i32 : i32, i32
  }
  func.func @transform_2(%arg0: i32) -> (i32, i32) {
    %c0_i32 = arith.constant 0 : i32
    %c0_i32_0 = arith.constant 0 : i32
    return %arg0, %c0_i32 : i32, i32
  }
  func.func @transform_3(%arg0: i32) -> (i32, i32) {
    %c0_i32 = arith.constant 0 : i32
    %c0_i32_0 = arith.constant 0 : i32
    %c0_i32_1 = arith.constant 0 : i32
    return %c0_i32, %c0_i32_0 : i32, i32
  }
  func.func @transform_4(%arg0: i32) -> (i32, i32) {
    %c0_i32 = arith.constant 0 : i32
    %c0_i32_0 = arith.constant 0 : i32
    %c0_i32_1 = arith.constant 0 : i32
    return %c0_i32, %c0_i32_0 : i32, i32
  }
  func.func @transform_5(%arg0: i32) -> (i32, i32) {
    %c0_i32 = arith.constant 0 : i32
    %c0_i32_0 = arith.constant 0 : i32
    %c0_i32_1 = arith.constant 0 : i32
    return %c0_i32, %c0_i32_0 : i32, i32
  }
  func.func @transform_6(%arg0: i32) -> (i32, i32) {
    %c0_i32 = arith.constant 0 : i32
    %c0_i32_0 = arith.constant 0 : i32
    %c0_i32_1 = arith.constant 0 : i32
    return %c0_i32, %c0_i32_0 : i32, i32
  }
  func.func @transform_7(%arg0: i32) -> (i32, i32) {
    %c0_i32 = arith.constant 0 : i32
    %c0_i32_0 = arith.constant 0 : i32
    %c0_i32_1 = arith.constant 0 : i32
    return %c0_i32, %c0_i32_0 : i32, i32
  }
  func.func @transform_8(%arg0: i32) -> (i32, i32) {
    %c0_i32 = arith.constant 0 : i32
    %c0_i32_0 = arith.constant 0 : i32
    %c0_i32_1 = arith.constant 0 : i32
    return %c0_i32, %c0_i32_0 : i32, i32
  }
  func.func @transform_9(%arg0: i32) -> (i32, i32) {
    %c0_i32 = arith.constant 0 : i32
    %c0_i32_0 = arith.constant 0 : i32
    return %arg0, %c0_i32 : i32, i32
  }
  func.func @transform_10(%arg0: i32) -> (i32, i32) {
    %c0_i32 = arith.constant 0 : i32
    %c0_i32_0 = arith.constant 0 : i32
    return %arg0, %c0_i32 : i32, i32
  }
  func.func @transform_11(%arg0: i32) -> (i32, i32) {
    %c0_i32 = arith.constant 0 : i32
    %c0_i32_0 = arith.constant 0 : i32
    return %arg0, %c0_i32 : i32, i32
  }
}

module attributes {stable_mosaic.version = 11 : i64} {
  func.func @_attn_kernel(%arg0: i32, %arg1: i32, %arg2: i32, %arg3: memref<1x8x32xf32, #tpu.memory_space<vmem>>, %arg4: memref<1x8x32xf32, #tpu.memory_space<vmem>>, %arg5: memref<1x8x32xf32, #tpu.memory_space<vmem>>, %arg6: memref<1x1x8x8xi8, #tpu.memory_space<vmem>>, %arg7: memref<1x8x32xf32, #tpu.memory_space<vmem>>, %arg8: memref<8x32xf32, #tpu.memory_space<vmem>>, %arg9: memref<8x4xf32, #tpu.memory_space<vmem>>, %arg10: memref<8x4xf32, #tpu.memory_space<vmem>>) attributes {dimension_semantics = [#tpu.dimension_semantics<parallel>, #tpu.dimension_semantics<parallel>, #tpu.dimension_semantics<arbitrary>], iteration_bounds = array<i64: 2, 1, 1>, scalar_prefetch = 0 : i64, scratch_operands = 3 : i64, tpu.core_type = #tpu.core_type<tc>, window_params = [{transform_indices = @transform_0, window_bounds = array<i64: 1, 8, 32>}, {transform_indices = @transform_1, window_bounds = array<i64: 1, 8, 32>}, {transform_indices = @transform_2, window_bounds = array<i64: 1, 8, 32>}, {transform_indices = @transform_3, window_bounds = array<i64: 1, 1, 8, 8>}, {transform_indices = @transform_4, window_bounds = array<i64: 1, 8, 32>}]} {
    %c0_i32 = arith.constant 0 : i32
    %0 = arith.cmpi eq, %arg2, %c0_i32 : i32
    %1 = arith.extui %0 : i1 to i32
    %c0_i32_0 = arith.constant 0 : i32
    %2 = arith.cmpi ne, %1, %c0_i32_0 : i32
    scf.if %2 {
      %cst_107 = arith.constant 0xFF800000 : f32
      %142 = vector.broadcast %cst_107 : f32 to vector<8x4xf32>
      %c0_108 = arith.constant 0 : index
      %c0_109 = arith.constant 0 : index
      %143 = vector.load %arg9[%c0_108, %c0_109] : memref<8x4xf32, #tpu.memory_space<vmem>>, vector<8x4xf32>
      tpu.vector_store %arg9[%c0_108, %c0_109], %142 {strides = array<i32>} : memref<8x4xf32, #tpu.memory_space<vmem>>, vector<8x4xf32>,
      %cst_110 = arith.constant 0.000000e+00 : f32
      %144 = vector.broadcast %cst_110 : f32 to vector<8x4xf32>
      %c0_111 = arith.constant 0 : index
      %c0_112 = arith.constant 0 : index
      %145 = vector.load %arg10[%c0_111, %c0_112] : memref<8x4xf32, #tpu.memory_space<vmem>>, vector<8x4xf32>
      tpu.vector_store %arg10[%c0_111, %c0_112], %144 {strides = array<i32>} : memref<8x4xf32, #tpu.memory_space<vmem>>, vector<8x4xf32>,
      %cst_113 = arith.constant 0.000000e+00 : f32
      %146 = vector.broadcast %cst_113 : f32 to vector<8x32xf32>
      %c0_114 = arith.constant 0 : index
      %c0_115 = arith.constant 0 : index
      %147 = vector.load %arg8[%c0_114, %c0_115] : memref<8x32xf32, #tpu.memory_space<vmem>>, vector<8x32xf32>
      tpu.vector_store %arg8[%c0_114, %c0_115], %146 {strides = array<i32>} : memref<8x32xf32, #tpu.memory_space<vmem>>, vector<8x32xf32>,
    } else {
    }
    %c0 = arith.constant 0 : index
    %c0_1 = arith.constant 0 : index
    %c0_2 = arith.constant 0 : index
    %c0_3 = arith.constant 0 : index
    %3 = vector.load %arg6[%c0, %c0_1, %c0_2, %c0_3] : memref<1x1x8x8xi8, #tpu.memory_space<vmem>>, vector<1x1x8x8xi8>
    %4 = vector.shape_cast %3 : vector<1x1x8x8xi8> to vector<8x8xi8>
    %c0_i8 = arith.constant 0 : i8
    %5 = vector.broadcast %c0_i8 : i8 to vector<8x8xi8>
    %6 = arith.cmpi ne, %4, %5 : vector<8x8xi8>
    %c0_4 = arith.constant 0 : index
    %c0_5 = arith.constant 0 : index
    %c0_6 = arith.constant 0 : index
    %7 = vector.load %arg3[%c0_4, %c0_5, %c0_6] : memref<1x8x32xf32, #tpu.memory_space<vmem>>, vector<1x8x8xf32>
    %8 = vector.shape_cast %7 : vector<1x8x8xf32> to vector<8x8xf32>
    %c0_7 = arith.constant 0 : index
    %c0_8 = arith.constant 0 : index
    %c0_9 = arith.constant 0 : index
    %9 = vector.load %arg4[%c0_7, %c0_8, %c0_9] : memref<1x8x32xf32, #tpu.memory_space<vmem>>, vector<1x8x8xf32>
    %10 = vector.shape_cast %9 : vector<1x8x8xf32> to vector<8x8xf32>
    %c0_10 = arith.constant 0 : index
    %c0_11 = arith.constant 0 : index
    %c0_12 = arith.constant 0 : index
    %11 = vector.load %arg5[%c0_10, %c0_11, %c0_12] : memref<1x8x32xf32, #tpu.memory_space<vmem>>, vector<1x8x8xf32>
    %12 = vector.shape_cast %11 : vector<1x8x8xf32> to vector<8x8xf32>
    %cst = arith.constant dense<0.000000e+00> : vector<8x8xf32>
    %13 = tpu.matmul %8, %10, %cst {dimension_numbers = #tpu.dot_dimension_numbers<[1], [1], [0], [0], [0, 0, 1, 0], [], []>} : vector<8x8xf32>, vector<8x8xf32>, vector<8x8xf32> -> vector<8x8xf32>
    %cst_13 = arith.constant 0.353553385 : f32
    %14 = vector.broadcast %cst_13 : f32 to vector<8x8xf32>
    %15 = arith.mulf %13, %14 : vector<8x8xf32>
    %cst_14 = arith.constant -1.000000e+09 : f32
    %16 = vector.broadcast %cst_14 : f32 to vector<8x8xf32>
    %17 = arith.select %6, %15, %16 : vector<8x8xi1>, vector<8x8xf32>
    %c0_15 = arith.constant 0 : index
    %c0_16 = arith.constant 0 : index
    %18 = vector.load %arg9[%c0_15, %c0_16] : memref<8x4xf32, #tpu.memory_space<vmem>>, vector<8x1xf32>
    %cst_17 = arith.constant dense<0xFF800000> : vector<8xf32>
    %19 = vector.multi_reduction <maximumf>, %17, %cst_17 [1] : vector<8x8xf32> to vector<8xf32>
    %20 = vector.shape_cast %19 : vector<8xf32> to vector<8x1xf32>
    %21 = arith.maximumf %18, %20 : vector<8x1xf32>
    %22 = arith.subf %18, %21 : vector<8x1xf32>
    %23 = math.exp %22 : vector<8x1xf32>
    %24 = vector.broadcast %21 : vector<8x1xf32> to vector<8x8xf32>
    %25 = arith.subf %17, %24 : vector<8x8xf32>
    %26 = math.exp %25 : vector<8x8xf32>
    %c0_18 = arith.constant 0 : index
    %c0_19 = arith.constant 0 : index
    %27 = vector.load %arg10[%c0_18, %c0_19] : memref<8x4xf32, #tpu.memory_space<vmem>>, vector<8x1xf32>
    %28 = arith.mulf %23, %27 : vector<8x1xf32>
    %cst_20 = arith.constant dense<0.000000e+00> : vector<8xf32>
    %29 = vector.multi_reduction <add>, %26, %cst_20 [1] : vector<8x8xf32> to vector<8xf32>
    %30 = vector.shape_cast %29 : vector<8xf32> to vector<8x1xf32>
    %31 = arith.addf %28, %30 : vector<8x1xf32>
    %c0_21 = arith.constant 0 : index
    %c0_22 = arith.constant 0 : index
    %32 = vector.load %arg10[%c0_21, %c0_22] : memref<8x4xf32, #tpu.memory_space<vmem>>, vector<8x1xf32>
    tpu.vector_store %arg10[%c0_21, %c0_22], %31 {strides = array<i32>} : memref<8x4xf32, #tpu.memory_space<vmem>>, vector<8x1xf32>,
    %c0_23 = arith.constant 0 : index
    %c0_24 = arith.constant 0 : index
    %33 = vector.load %arg8[%c0_23, %c0_24] : memref<8x32xf32, #tpu.memory_space<vmem>>, vector<8x8xf32>
    %34 = vector.broadcast %23 : vector<8x1xf32> to vector<8x8xf32>
    %35 = arith.mulf %34, %33 : vector<8x8xf32>
    %cst_25 = arith.constant dense<0.000000e+00> : vector<8x8xf32>
    %36 = tpu.matmul %26, %12, %cst_25 {dimension_numbers = #tpu.dot_dimension_numbers<[1], [0], [0], [1], [0, 0, 1, 1], [], []>} : vector<8x8xf32>, vector<8x8xf32>, vector<8x8xf32> -> vector<8x8xf32>
    %37 = arith.addf %35, %36 : vector<8x8xf32>
    %c0_26 = arith.constant 0 : index
    %c0_27 = arith.constant 0 : index
    %38 = vector.load %arg8[%c0_26, %c0_27] : memref<8x32xf32, #tpu.memory_space<vmem>>, vector<8x8xf32>
    tpu.vector_store %arg8[%c0_26, %c0_27], %37 {strides = array<i32>} : memref<8x32xf32, #tpu.memory_space<vmem>>, vector<8x8xf32>,
    %c0_28 = arith.constant 0 : index
    %c0_29 = arith.constant 0 : index
    %39 = vector.load %arg9[%c0_28, %c0_29] : memref<8x4xf32, #tpu.memory_space<vmem>>, vector<8x1xf32>
    tpu.vector_store %arg9[%c0_28, %c0_29], %21 {strides = array<i32>} : memref<8x4xf32, #tpu.memory_space<vmem>>, vector<8x1xf32>,
    %c0_30 = arith.constant 0 : index
    %c0_31 = arith.constant 0 : index
    %c8 = arith.constant 8 : index
    %40 = vector.load %arg3[%c0_30, %c0_31, %c8] : memref<1x8x32xf32, #tpu.memory_space<vmem>>, vector<1x8x8xf32>
    %41 = vector.shape_cast %40 : vector<1x8x8xf32> to vector<8x8xf32>
    %c0_32 = arith.constant 0 : index
    %c0_33 = arith.constant 0 : index
    %c8_34 = arith.constant 8 : index
    %42 = vector.load %arg4[%c0_32, %c0_33, %c8_34] : memref<1x8x32xf32, #tpu.memory_space<vmem>>, vector<1x8x8xf32>
    %43 = vector.shape_cast %42 : vector<1x8x8xf32> to vector<8x8xf32>
    %c0_35 = arith.constant 0 : index
    %c0_36 = arith.constant 0 : index
    %c8_37 = arith.constant 8 : index
    %44 = vector.load %arg5[%c0_35, %c0_36, %c8_37] : memref<1x8x32xf32, #tpu.memory_space<vmem>>, vector<1x8x8xf32>
    %45 = vector.shape_cast %44 : vector<1x8x8xf32> to vector<8x8xf32>
    %cst_38 = arith.constant dense<0.000000e+00> : vector<8x8xf32>
    %46 = tpu.matmul %41, %43, %cst_38 {dimension_numbers = #tpu.dot_dimension_numbers<[1], [1], [0], [0], [0, 0, 1, 0], [], []>} : vector<8x8xf32>, vector<8x8xf32>, vector<8x8xf32> -> vector<8x8xf32>
    %cst_39 = arith.constant 0.353553385 : f32
    %47 = vector.broadcast %cst_39 : f32 to vector<8x8xf32>
    %48 = arith.mulf %46, %47 : vector<8x8xf32>
    %cst_40 = arith.constant -1.000000e+09 : f32
    %49 = vector.broadcast %cst_40 : f32 to vector<8x8xf32>
    %50 = arith.select %6, %48, %49 : vector<8x8xi1>, vector<8x8xf32>
    %c0_41 = arith.constant 0 : index
    %c1 = arith.constant 1 : index
    %51 = vector.load %arg9[%c0_41, %c1] : memref<8x4xf32, #tpu.memory_space<vmem>>, vector<8x1xf32>
    %cst_42 = arith.constant dense<0xFF800000> : vector<8xf32>
    %52 = vector.multi_reduction <maximumf>, %50, %cst_42 [1] : vector<8x8xf32> to vector<8xf32>
    %53 = vector.shape_cast %52 : vector<8xf32> to vector<8x1xf32>
    %54 = arith.maximumf %51, %53 : vector<8x1xf32>
    %55 = arith.subf %51, %54 : vector<8x1xf32>
    %56 = math.exp %55 : vector<8x1xf32>
    %57 = vector.broadcast %54 : vector<8x1xf32> to vector<8x8xf32>
    %58 = arith.subf %50, %57 : vector<8x8xf32>
    %59 = math.exp %58 : vector<8x8xf32>
    %c0_43 = arith.constant 0 : index
    %c1_44 = arith.constant 1 : index
    %60 = vector.load %arg10[%c0_43, %c1_44] : memref<8x4xf32, #tpu.memory_space<vmem>>, vector<8x1xf32>
    %61 = arith.mulf %56, %60 : vector<8x1xf32>
    %cst_45 = arith.constant dense<0.000000e+00> : vector<8xf32>
    %62 = vector.multi_reduction <add>, %59, %cst_45 [1] : vector<8x8xf32> to vector<8xf32>
    %63 = vector.shape_cast %62 : vector<8xf32> to vector<8x1xf32>
    %64 = arith.addf %61, %63 : vector<8x1xf32>
    %c0_46 = arith.constant 0 : index
    %c1_47 = arith.constant 1 : index
    %65 = vector.load %arg10[%c0_46, %c1_47] : memref<8x4xf32, #tpu.memory_space<vmem>>, vector<8x1xf32>
    tpu.vector_store %arg10[%c0_46, %c1_47], %64 {strides = array<i32>} : memref<8x4xf32, #tpu.memory_space<vmem>>, vector<8x1xf32>,
    %c0_48 = arith.constant 0 : index
    %c8_49 = arith.constant 8 : index
    %66 = vector.load %arg8[%c0_48, %c8_49] : memref<8x32xf32, #tpu.memory_space<vmem>>, vector<8x8xf32>
    %67 = vector.broadcast %56 : vector<8x1xf32> to vector<8x8xf32>
    %68 = arith.mulf %67, %66 : vector<8x8xf32>
    %cst_50 = arith.constant dense<0.000000e+00> : vector<8x8xf32>
    %69 = tpu.matmul %59, %45, %cst_50 {dimension_numbers = #tpu.dot_dimension_numbers<[1], [0], [0], [1], [0, 0, 1, 1], [], []>} : vector<8x8xf32>, vector<8x8xf32>, vector<8x8xf32> -> vector<8x8xf32>
    %70 = arith.addf %68, %69 : vector<8x8xf32>
    %c0_51 = arith.constant 0 : index
    %c8_52 = arith.constant 8 : index
    %71 = vector.load %arg8[%c0_51, %c8_52] : memref<8x32xf32, #tpu.memory_space<vmem>>, vector<8x8xf32>
    tpu.vector_store %arg8[%c0_51, %c8_52], %70 {strides = array<i32>} : memref<8x32xf32, #tpu.memory_space<vmem>>, vector<8x8xf32>,
    %c0_53 = arith.constant 0 : index
    %c1_54 = arith.constant 1 : index
    %72 = vector.load %arg9[%c0_53, %c1_54] : memref<8x4xf32, #tpu.memory_space<vmem>>, vector<8x1xf32>
    tpu.vector_store %arg9[%c0_53, %c1_54], %54 {strides = array<i32>} : memref<8x4xf32, #tpu.memory_space<vmem>>, vector<8x1xf32>,
    %c0_55 = arith.constant 0 : index
    %c0_56 = arith.constant 0 : index
    %c16 = arith.constant 16 : index
    %73 = vector.load %arg3[%c0_55, %c0_56, %c16] : memref<1x8x32xf32, #tpu.memory_space<vmem>>, vector<1x8x8xf32>
    %74 = vector.shape_cast %73 : vector<1x8x8xf32> to vector<8x8xf32>
    %c0_57 = arith.constant 0 : index
    %c0_58 = arith.constant 0 : index
    %c16_59 = arith.constant 16 : index
    %75 = vector.load %arg4[%c0_57, %c0_58, %c16_59] : memref<1x8x32xf32, #tpu.memory_space<vmem>>, vector<1x8x8xf32>
    %76 = vector.shape_cast %75 : vector<1x8x8xf32> to vector<8x8xf32>
    %c0_60 = arith.constant 0 : index
    %c0_61 = arith.constant 0 : index
    %c16_62 = arith.constant 16 : index
    %77 = vector.load %arg5[%c0_60, %c0_61, %c16_62] : memref<1x8x32xf32, #tpu.memory_space<vmem>>, vector<1x8x8xf32>
    %78 = vector.shape_cast %77 : vector<1x8x8xf32> to vector<8x8xf32>
    %cst_63 = arith.constant dense<0.000000e+00> : vector<8x8xf32>
    %79 = tpu.matmul %74, %76, %cst_63 {dimension_numbers = #tpu.dot_dimension_numbers<[1], [1], [0], [0], [0, 0, 1, 0], [], []>} : vector<8x8xf32>, vector<8x8xf32>, vector<8x8xf32> -> vector<8x8xf32>
    %cst_64 = arith.constant 0.353553385 : f32
    %80 = vector.broadcast %cst_64 : f32 to vector<8x8xf32>
    %81 = arith.mulf %79, %80 : vector<8x8xf32>
    %cst_65 = arith.constant -1.000000e+09 : f32
    %82 = vector.broadcast %cst_65 : f32 to vector<8x8xf32>
    %83 = arith.select %6, %81, %82 : vector<8x8xi1>, vector<8x8xf32>
    %c0_66 = arith.constant 0 : index
    %c2 = arith.constant 2 : index
    %84 = vector.load %arg9[%c0_66, %c2] : memref<8x4xf32, #tpu.memory_space<vmem>>, vector<8x1xf32>
    %cst_67 = arith.constant dense<0xFF800000> : vector<8xf32>
    %85 = vector.multi_reduction <maximumf>, %83, %cst_67 [1] : vector<8x8xf32> to vector<8xf32>
    %86 = vector.shape_cast %85 : vector<8xf32> to vector<8x1xf32>
    %87 = arith.maximumf %84, %86 : vector<8x1xf32>
    %88 = arith.subf %84, %87 : vector<8x1xf32>
    %89 = math.exp %88 : vector<8x1xf32>
    %90 = vector.broadcast %87 : vector<8x1xf32> to vector<8x8xf32>
    %91 = arith.subf %83, %90 : vector<8x8xf32>
    %92 = math.exp %91 : vector<8x8xf32>
    %c0_68 = arith.constant 0 : index
    %c2_69 = arith.constant 2 : index
    %93 = vector.load %arg10[%c0_68, %c2_69] : memref<8x4xf32, #tpu.memory_space<vmem>>, vector<8x1xf32>
    %94 = arith.mulf %89, %93 : vector<8x1xf32>
    %cst_70 = arith.constant dense<0.000000e+00> : vector<8xf32>
    %95 = vector.multi_reduction <add>, %92, %cst_70 [1] : vector<8x8xf32> to vector<8xf32>
    %96 = vector.shape_cast %95 : vector<8xf32> to vector<8x1xf32>
    %97 = arith.addf %94, %96 : vector<8x1xf32>
    %c0_71 = arith.constant 0 : index
    %c2_72 = arith.constant 2 : index
    %98 = vector.load %arg10[%c0_71, %c2_72] : memref<8x4xf32, #tpu.memory_space<vmem>>, vector<8x1xf32>
    tpu.vector_store %arg10[%c0_71, %c2_72], %97 {strides = array<i32>} : memref<8x4xf32, #tpu.memory_space<vmem>>, vector<8x1xf32>,
    %c0_73 = arith.constant 0 : index
    %c16_74 = arith.constant 16 : index
    %99 = vector.load %arg8[%c0_73, %c16_74] : memref<8x32xf32, #tpu.memory_space<vmem>>, vector<8x8xf32>
    %100 = vector.broadcast %89 : vector<8x1xf32> to vector<8x8xf32>
    %101 = arith.mulf %100, %99 : vector<8x8xf32>
    %cst_75 = arith.constant dense<0.000000e+00> : vector<8x8xf32>
    %102 = tpu.matmul %92, %78, %cst_75 {dimension_numbers = #tpu.dot_dimension_numbers<[1], [0], [0], [1], [0, 0, 1, 1], [], []>} : vector<8x8xf32>, vector<8x8xf32>, vector<8x8xf32> -> vector<8x8xf32>
    %103 = arith.addf %101, %102 : vector<8x8xf32>
    %c0_76 = arith.constant 0 : index
    %c16_77 = arith.constant 16 : index
    %104 = vector.load %arg8[%c0_76, %c16_77] : memref<8x32xf32, #tpu.memory_space<vmem>>, vector<8x8xf32>
    tpu.vector_store %arg8[%c0_76, %c16_77], %103 {strides = array<i32>} : memref<8x32xf32, #tpu.memory_space<vmem>>, vector<8x8xf32>,
    %c0_78 = arith.constant 0 : index
    %c2_79 = arith.constant 2 : index
    %105 = vector.load %arg9[%c0_78, %c2_79] : memref<8x4xf32, #tpu.memory_space<vmem>>, vector<8x1xf32>
    tpu.vector_store %arg9[%c0_78, %c2_79], %87 {strides = array<i32>} : memref<8x4xf32, #tpu.memory_space<vmem>>, vector<8x1xf32>,
    %c0_80 = arith.constant 0 : index
    %c0_81 = arith.constant 0 : index
    %c24 = arith.constant 24 : index
    %106 = vector.load %arg3[%c0_80, %c0_81, %c24] : memref<1x8x32xf32, #tpu.memory_space<vmem>>, vector<1x8x8xf32>
    %107 = vector.shape_cast %106 : vector<1x8x8xf32> to vector<8x8xf32>
    %c0_82 = arith.constant 0 : index
    %c0_83 = arith.constant 0 : index
    %c24_84 = arith.constant 24 : index
    %108 = vector.load %arg4[%c0_82, %c0_83, %c24_84] : memref<1x8x32xf32, #tpu.memory_space<vmem>>, vector<1x8x8xf32>
    %109 = vector.shape_cast %108 : vector<1x8x8xf32> to vector<8x8xf32>
    %c0_85 = arith.constant 0 : index
    %c0_86 = arith.constant 0 : index
    %c24_87 = arith.constant 24 : index
    %110 = vector.load %arg5[%c0_85, %c0_86, %c24_87] : memref<1x8x32xf32, #tpu.memory_space<vmem>>, vector<1x8x8xf32>
    %111 = vector.shape_cast %110 : vector<1x8x8xf32> to vector<8x8xf32>
    %cst_88 = arith.constant dense<0.000000e+00> : vector<8x8xf32>
    %112 = tpu.matmul %107, %109, %cst_88 {dimension_numbers = #tpu.dot_dimension_numbers<[1], [1], [0], [0], [0, 0, 1, 0], [], []>} : vector<8x8xf32>, vector<8x8xf32>, vector<8x8xf32> -> vector<8x8xf32>
    %cst_89 = arith.constant 0.353553385 : f32
    %113 = vector.broadcast %cst_89 : f32 to vector<8x8xf32>
    %114 = arith.mulf %112, %113 : vector<8x8xf32>
    %cst_90 = arith.constant -1.000000e+09 : f32
    %115 = vector.broadcast %cst_90 : f32 to vector<8x8xf32>
    %116 = arith.select %6, %114, %115 : vector<8x8xi1>, vector<8x8xf32>
    %c0_91 = arith.constant 0 : index
    %c3 = arith.constant 3 : index
    %117 = vector.load %arg9[%c0_91, %c3] : memref<8x4xf32, #tpu.memory_space<vmem>>, vector<8x1xf32>
    %cst_92 = arith.constant dense<0xFF800000> : vector<8xf32>
    %118 = vector.multi_reduction <maximumf>, %116, %cst_92 [1] : vector<8x8xf32> to vector<8xf32>
    %119 = vector.shape_cast %118 : vector<8xf32> to vector<8x1xf32>
    %120 = arith.maximumf %117, %119 : vector<8x1xf32>
    %121 = arith.subf %117, %120 : vector<8x1xf32>
    %122 = math.exp %121 : vector<8x1xf32>
    %123 = vector.broadcast %120 : vector<8x1xf32> to vector<8x8xf32>
    %124 = arith.subf %116, %123 : vector<8x8xf32>
    %125 = math.exp %124 : vector<8x8xf32>
    %c0_93 = arith.constant 0 : index
    %c3_94 = arith.constant 3 : index
    %126 = vector.load %arg10[%c0_93, %c3_94] : memref<8x4xf32, #tpu.memory_space<vmem>>, vector<8x1xf32>
    %127 = arith.mulf %122, %126 : vector<8x1xf32>
    %cst_95 = arith.constant dense<0.000000e+00> : vector<8xf32>
    %128 = vector.multi_reduction <add>, %125, %cst_95 [1] : vector<8x8xf32> to vector<8xf32>
    %129 = vector.shape_cast %128 : vector<8xf32> to vector<8x1xf32>
    %130 = arith.addf %127, %129 : vector<8x1xf32>
    %c0_96 = arith.constant 0 : index
    %c3_97 = arith.constant 3 : index
    %131 = vector.load %arg10[%c0_96, %c3_97] : memref<8x4xf32, #tpu.memory_space<vmem>>, vector<8x1xf32>
    tpu.vector_store %arg10[%c0_96, %c3_97], %130 {strides = array<i32>} : memref<8x4xf32, #tpu.memory_space<vmem>>, vector<8x1xf32>,
    %c0_98 = arith.constant 0 : index
    %c24_99 = arith.constant 24 : index
    %132 = vector.load %arg8[%c0_98, %c24_99] : memref<8x32xf32, #tpu.memory_space<vmem>>, vector<8x8xf32>
    %133 = vector.broadcast %122 : vector<8x1xf32> to vector<8x8xf32>
    %134 = arith.mulf %133, %132 : vector<8x8xf32>
    %cst_100 = arith.constant dense<0.000000e+00> : vector<8x8xf32>
    %135 = tpu.matmul %125, %111, %cst_100 {dimension_numbers = #tpu.dot_dimension_numbers<[1], [0], [0], [1], [0, 0, 1, 1], [], []>} : vector<8x8xf32>, vector<8x8xf32>, vector<8x8xf32> -> vector<8x8xf32>
    %136 = arith.addf %134, %135 : vector<8x8xf32>
    %c0_101 = arith.constant 0 : index
    %c24_102 = arith.constant 24 : index
    %137 = vector.load %arg8[%c0_101, %c24_102] : memref<8x32xf32, #tpu.memory_space<vmem>>, vector<8x8xf32>
    tpu.vector_store %arg8[%c0_101, %c24_102], %136 {strides = array<i32>} : memref<8x32xf32, #tpu.memory_space<vmem>>, vector<8x8xf32>,
    %c0_103 = arith.constant 0 : index
    %c3_104 = arith.constant 3 : index
    %138 = vector.load %arg9[%c0_103, %c3_104] : memref<8x4xf32, #tpu.memory_space<vmem>>, vector<8x1xf32>
    tpu.vector_store %arg9[%c0_103, %c3_104], %120 {strides = array<i32>} : memref<8x4xf32, #tpu.memory_space<vmem>>, vector<8x1xf32>,
    %c0_i32_105 = arith.constant 0 : i32
    %139 = arith.cmpi eq, %arg2, %c0_i32_105 : i32
    %140 = arith.extui %139 : i1 to i32
    %c0_i32_106 = arith.constant 0 : i32
    %141 = arith.cmpi ne, %140, %c0_i32_106 : i32
    scf.if %141 {
      %c0_107 = arith.constant 0 : index
      %c0_108 = arith.constant 0 : index
      %142 = vector.load %arg10[%c0_107, %c0_108] : memref<8x4xf32, #tpu.memory_space<vmem>>, vector<8x4xf32>
      %143 = tpu.reciprocal %142 {approx = true} : vector<8x4xf32> -> vector<8x4xf32>
      %c0_109 = arith.constant 0 : index
      %c0_110 = arith.constant 0 : index
      %144 = vector.load %arg8[%c0_109, %c0_110] : memref<8x32xf32, #tpu.memory_space<vmem>>, vector<8x8xf32>
      %145 = vector.extract_strided_slice %143 {offsets = [0, 0], sizes = [8, 1], strides = [1, 1]} : vector<8x4xf32> to vector<8x1xf32>
      %146 = vector.broadcast %145 : vector<8x1xf32> to vector<8x8xf32>
      %147 = arith.mulf %144, %146 : vector<8x8xf32>
      %c0_111 = arith.constant 0 : index
      %c0_112 = arith.constant 0 : index
      %148 = vector.load %arg8[%c0_111, %c0_112] : memref<8x32xf32, #tpu.memory_space<vmem>>, vector<8x8xf32>
      tpu.vector_store %arg8[%c0_111, %c0_112], %147 {strides = array<i32>} : memref<8x32xf32, #tpu.memory_space<vmem>>, vector<8x8xf32>,
      %c0_113 = arith.constant 0 : index
      %c8_114 = arith.constant 8 : index
      %149 = vector.load %arg8[%c0_113, %c8_114] : memref<8x32xf32, #tpu.memory_space<vmem>>, vector<8x8xf32>
      %150 = vector.extract_strided_slice %143 {offsets = [0, 1], sizes = [8, 1], strides = [1, 1]} : vector<8x4xf32> to vector<8x1xf32>
      %151 = vector.broadcast %150 : vector<8x1xf32> to vector<8x8xf32>
      %152 = arith.mulf %149, %151 : vector<8x8xf32>
      %c0_115 = arith.constant 0 : index
      %c8_116 = arith.constant 8 : index
      %153 = vector.load %arg8[%c0_115, %c8_116] : memref<8x32xf32, #tpu.memory_space<vmem>>, vector<8x8xf32>
      tpu.vector_store %arg8[%c0_115, %c8_116], %152 {strides = array<i32>} : memref<8x32xf32, #tpu.memory_space<vmem>>, vector<8x8xf32>,
      %c0_117 = arith.constant 0 : index
      %c16_118 = arith.constant 16 : index
      %154 = vector.load %arg8[%c0_117, %c16_118] : memref<8x32xf32, #tpu.memory_space<vmem>>, vector<8x8xf32>
      %155 = vector.extract_strided_slice %143 {offsets = [0, 2], sizes = [8, 1], strides = [1, 1]} : vector<8x4xf32> to vector<8x1xf32>
      %156 = vector.broadcast %155 : vector<8x1xf32> to vector<8x8xf32>
      %157 = arith.mulf %154, %156 : vector<8x8xf32>
      %c0_119 = arith.constant 0 : index
      %c16_120 = arith.constant 16 : index
      %158 = vector.load %arg8[%c0_119, %c16_120] : memref<8x32xf32, #tpu.memory_space<vmem>>, vector<8x8xf32>
      tpu.vector_store %arg8[%c0_119, %c16_120], %157 {strides = array<i32>} : memref<8x32xf32, #tpu.memory_space<vmem>>, vector<8x8xf32>,
      %c0_121 = arith.constant 0 : index
      %c24_122 = arith.constant 24 : index
      %159 = vector.load %arg8[%c0_121, %c24_122] : memref<8x32xf32, #tpu.memory_space<vmem>>, vector<8x8xf32>
      %160 = vector.extract_strided_slice %143 {offsets = [0, 3], sizes = [8, 1], strides = [1, 1]} : vector<8x4xf32> to vector<8x1xf32>
      %161 = vector.broadcast %160 : vector<8x1xf32> to vector<8x8xf32>
      %162 = arith.mulf %159, %161 : vector<8x8xf32>
      %c0_123 = arith.constant 0 : index
      %c24_124 = arith.constant 24 : index
      %163 = vector.load %arg8[%c0_123, %c24_124] : memref<8x32xf32, #tpu.memory_space<vmem>>, vector<8x8xf32>
      tpu.vector_store %arg8[%c0_123, %c24_124], %162 {strides = array<i32>} : memref<8x32xf32, #tpu.memory_space<vmem>>, vector<8x8xf32>,
      %c0_125 = arith.constant 0 : index
      %c0_126 = arith.constant 0 : index
      %164 = vector.load %arg8[%c0_125, %c0_126] : memref<8x32xf32, #tpu.memory_space<vmem>>, vector<8x32xf32>
      %c0_127 = arith.constant 0 : index
      %c0_128 = arith.constant 0 : index
      %c0_129 = arith.constant 0 : index
      %165 = vector.load %arg7[%c0_127, %c0_128, %c0_129] : memref<1x8x32xf32, #tpu.memory_space<vmem>>, vector<1x8x32xf32>
      %166 = vector.shape_cast %165 : vector<1x8x32xf32> to vector<8x32xf32>
      %167 = vector.shape_cast %164 : vector<8x32xf32> to vector<1x8x32xf32>
      tpu.vector_store %arg7[%c0_127, %c0_128, %c0_129], %167 {strides = array<i32>} : memref<1x8x32xf32, #tpu.memory_space<vmem>>, vector<1x8x32xf32>,
    } else {
    }
    return
  }
  func.func @transform_0(%arg0: i32, %arg1: i32, %arg2: i32) -> (i32, i32, i32) {
    %c0_i32 = arith.constant 0 : i32
    %c0_i32_0 = arith.constant 0 : i32
    return %arg0, %arg1, %c0_i32 : i32, i32, i32
  }
  func.func @transform_1(%arg0: i32, %arg1: i32, %arg2: i32) -> (i32, i32, i32) {
    %c0_i32 = arith.constant 0 : i32
    %c0_i32_0 = arith.constant 0 : i32
    return %arg0, %arg2, %c0_i32 : i32, i32, i32
  }
  func.func @transform_2(%arg0: i32, %arg1: i32, %arg2: i32) -> (i32, i32, i32) {
    %c0_i32 = arith.constant 0 : i32
    %c0_i32_0 = arith.constant 0 : i32
    return %arg0, %arg2, %c0_i32 : i32, i32, i32
  }
  func.func @transform_3(%arg0: i32, %arg1: i32, %arg2: i32) -> (i32, i32, i32, i32) {
    %c0_i32 = arith.constant 0 : i32
    %c0_i32_0 = arith.constant 0 : i32
    return %arg0, %c0_i32, %arg1, %arg2 : i32, i32, i32, i32
  }
  func.func @transform_4(%arg0: i32, %arg1: i32, %arg2: i32) -> (i32, i32, i32) {
    %c0_i32 = arith.constant 0 : i32
    %c0_i32_0 = arith.constant 0 : i32
    return %arg0, %arg1, %c0_i32 : i32, i32, i32
  }
}

module attributes {stable_mosaic.version = 11 : i64} {
  func.func @_linear_kernel(%arg0: i32, %arg1: memref<16x32xf32, #tpu.memory_space<vmem>>, %arg2: memref<32x32xf32, #tpu.memory_space<vmem>>, %arg3: memref<1x32xf32, #tpu.memory_space<vmem>>, %arg4: memref<16x32xf32, #tpu.memory_space<vmem>>) attributes {dimension_semantics = [#tpu.dimension_semantics<parallel>], iteration_bounds = array<i64: 1>, scalar_prefetch = 0 : i64, scratch_operands = 0 : i64, tpu.core_type = #tpu.core_type<tc>, window_params = [{transform_indices = @transform_0, window_bounds = array<i64: 16, 32>}, {pipeline_mode = #tpu.pipeline_mode<synchronous>, transform_indices = @transform_1, window_bounds = array<i64: 32, 32>}, {pipeline_mode = #tpu.pipeline_mode<synchronous>, transform_indices = @transform_2, window_bounds = array<i64: 1, 32>}, {transform_indices = @transform_3, window_bounds = array<i64: 16, 32>}]} {
    %c0 = arith.constant 0 : index
    %c0_0 = arith.constant 0 : index
    %0 = vector.load %arg1[%c0, %c0_0] : memref<16x32xf32, #tpu.memory_space<vmem>>, vector<16x32xf32>
    %c0_1 = arith.constant 0 : index
    %c0_2 = arith.constant 0 : index
    %1 = vector.load %arg2[%c0_1, %c0_2] : memref<32x32xf32, #tpu.memory_space<vmem>>, vector<32x32xf32>
    %cst = arith.constant dense<0.000000e+00> : vector<16x32xf32>
    %2 = tpu.matmul %0, %1, %cst {dimension_numbers = #tpu.dot_dimension_numbers<[1], [0], [0], [1], [0, 0, 1, 1], [], []>} : vector<16x32xf32>, vector<32x32xf32>, vector<16x32xf32> -> vector<16x32xf32>
    %c0_3 = arith.constant 0 : index
    %c0_4 = arith.constant 0 : index
    %3 = vector.load %arg3[%c0_3, %c0_4] : memref<1x32xf32, #tpu.memory_space<vmem>>, vector<1x32xf32>
    %4 = vector.broadcast %3 : vector<1x32xf32> to vector<16x32xf32>
    %5 = arith.addf %2, %4 : vector<16x32xf32>
    %c0_5 = arith.constant 0 : index
    %c0_6 = arith.constant 0 : index
    %6 = vector.load %arg4[%c0_5, %c0_6] : memref<16x32xf32, #tpu.memory_space<vmem>>, vector<16x32xf32>
    tpu.vector_store %arg4[%c0_5, %c0_6], %5 {strides = array<i32>} : memref<16x32xf32, #tpu.memory_space<vmem>>, vector<16x32xf32>,
    return
  }
  func.func @transform_0(%arg0: i32) -> (i32, i32) {
    %c0_i32 = arith.constant 0 : i32
    %c0_i32_0 = arith.constant 0 : i32
    return %arg0, %c0_i32 : i32, i32
  }
  func.func @transform_1(%arg0: i32) -> (i32, i32) {
    %c0_i32 = arith.constant 0 : i32
    %c0_i32_0 = arith.constant 0 : i32
    %c0_i32_1 = arith.constant 0 : i32
    return %c0_i32, %c0_i32_0 : i32, i32
  }
  func.func @transform_2(%arg0: i32) -> (i32, i32) {
    %c0_i32 = arith.constant 0 : i32
    %c0_i32_0 = arith.constant 0 : i32
    %c0_i32_1 = arith.constant 0 : i32
    return %c0_i32, %c0_i32_0 : i32, i32
  }
  func.func @transform_3(%arg0: i32) -> (i32, i32) {
    %c0_i32 = arith.constant 0 : i32
    %c0_i32_0 = arith.constant 0 : i32
    return %arg0, %c0_i32 : i32, i32
  }
}

</mosaic_0001>

<bundles_post_ra>
// kernel: _mha_forward_cross.5
= control target key start
LH: loop header
LB: loop body
LE: loop exit
PB: predicated region body
PF: predicated region fallthrough
CT: control target
= control target key end

     0   :  { %vm28_vm0 = vcmask 261120   ;;  %s243_s0 = inlined_call_operand.vmem [shape: f32[16,32], index: 0, kind: input, shape index: {}]   ;;  %s244_s1 = inlined_call_operand.vmem [shape: f32[32,32], index: 1, kind: input, shape index: {}]   ;;  %s245_s2 = inlined_call_operand.vmem [shape: f32[1,32], index: 2, kind: input, shape index: {}]   ;;  %s246_s3 = inlined_call_operand.hbm [shape: f32[16,32], index: 3, kind: output, shape index: {}]  }
   0x1   :  { %v17_v0 = vld [vmem:[%s244_s1] sm:$0xff]  ;;  %v18_v1 = vld [vmem:[%s244_s1 + $0x8] sm:$0xff]  ;;  %v19_v2 = vld [vmem:[%s244_s1 + $0x10] sm:$0xff] }
   0x2   :  { %v148_v3 = vpack.c.bf16 %v18_v1, %v17_v0  ;;  %v20_v4 = vld [vmem:[%s244_s1 + $0x18] sm:$0xff]  ;;  %v15_v5 = vld [vmem:[%s243_s0] sm:$0xff] }
   0x3   :  { %v152_v6 = vpack.c.bf16 %v20_v4, %v19_v2  ;;  %145 = vmatprep.mubr.msk.f32.mxu0 %vm28_vm0, %v15_v5 }
   0x4   :  { %8 = vsyncpa [#allocation3], 0  ;;  %149 = vmatprep.subr.bf16.mxu0 %v148_v3  ;;  %v16_v7 = vld [vmem:[%s243_s0 + $0x8] sm:$0xff]  ;;  %v128_v8 = vld [vmem:[%s245_s2] ss:$0 sm:$0xff]  ;;  %s183_s25 = smov [#allocation2]  }
   0x5   :  { %151 = vmatpush3.bf16.msra.mxu0 %v148_v3  ;;  %s117_s26 = sshll.u32 %s183_s25, 4  ;;  %s118_s26 = int_to_ptr.vmem [resolvable:$true] %s117_s26 }
   0x6   :  { %153 = vmatprep.subr.bf16.mxu0 %v152_v6  ;;  %s159_s27 = scalar_lea.vmem %s118_s26, 256  ;;  %p164_p1 = scmp.lt.s32.totalorder %s118_s26, %s118_s26 }
   0x7   :  { %p160_p0 = scmp.ne.s32.totalorder %s118_s26, %s159_s27  ;;  %p165_p2 = scmp.lt.s32.totalorder %s159_s27, %s159_s27 }
   0x9   :  { %155 = vmatpush3.bf16.msra.mxu0 %v152_v6  ;;  %p166_p3 = por %p165_p2, %p164_p1 }
   0xb   :  { %p167_p4 = pnand %p166_p3, %p160_p0 }
   0xc   :  { %146 = vmatmul.mubr.msk.f32.vlgmr.msra.gmra.mrb[0].mxu0 %vm28_vm0, %v16_v7 }
  0xdf   :  { %v147_v9 = vpop.f32.mrb[0].mxu0 }
  0xe0   :  { %v107_v10 = vadd.f32 %v147_v9, %v128_v8  ;;  %v101_v11 = vpop.f32.mrb[1].mxu0 }
  0xe1   :  { %v102_v12 = vadd.f32 %v128_v8, %v101_v11 }
  0xe2   :  { %111 = vst.msk [vmem:[#allocation2 + $0x8] sm:$0xff] %vm28_vm0, %v107_v10 }
  0xe3   :  { %110 = vst.msk [vmem:[#allocation2] sm:$0xff] %vm28_vm0, %v102_v12 }
  0xe4   :  { %170 = shalt.err (!%p167_p4)
}
  0xe5   :  { %s171_s28 = scalar_lea.hbm %s246_s3, 256 }
  0xe6   :  { %p172_p5 = scmp.ne.s32.totalorder %s246_s3, %s171_s28  ;;  %p175_p6 = scmp.lt.u32.totalorder %s171_s28, %s246_s3 }
  0xe8   :  { %p177_p7 = pnand %p175_p6, %p172_p5 }
  0xea   :  { %180 = shalt.err (!%p177_p7)
}
  0xeb   :  { %s184_s6 = smov 128   ;;  %s185_s7 = smov 8  }
  0xec   :  { %123 = dma.vmem_to_hbm [thread:$0]  %s118_s26, 256, %s246_s3, [#allocation3], %s184_s6, %s184_s6, %s185_s7  }
  0xed   :  { %181 = dma.done.wait [#allocation3], 256  }
  0xee   :  { %182 = vsyncadd [#allocation3], 4294967040 }
  0xef   :  { %127 = vsyncpa [#allocation3], 1 }

// kernel: _mha_forward_cross.3
= control target key start
LH: loop header
LB: loop body
LE: loop exit
PB: predicated region body
PF: predicated region fallthrough
CT: control target
= control target key end

     0   :  { %vm48_vm0 = vcmask 261120   ;;  %s573_s3 = inlined_call_operand.vmem [shape: f32[32,32], index: 3, kind: input, shape index: {}]   ;;  %s574_s0 = inlined_call_operand.vmem [shape: f32[16,32], index: 0, kind: input, shape index: {}]   ;;  %s575_s4 = inlined_call_operand.vmem [shape: f32[32,32], index: 4, kind: input, shape index: {}]   ;;  %s576_s5 = inlined_call_operand.vmem [shape: f32[32,32], index: 5, kind: input, shape index: {}]   ;;  %s577_s1 = inlined_call_operand.vmem [shape: f32[16,32], index: 1, kind: input, shape index: {}]   ;;  %s578_s2 = inlined_call_operand.vmem [shape: f32[16,32], index: 2, kind: input, shape index: {}]   ;;  %s579_s6 = inlined_call_operand.vmem [shape: f32[1,32], index: 6, kind: input, shape index: {}]   ;;  %s580_s7 = inlined_call_operand.vmem [shape: f32[1,32], index: 7, kind: input, shape index: {}]   ;;  %s581_s9 = inlined_call_operand.vmem [shape: f32[16,32], index: 9, kind: output, shape index: {0}]   ;;  %s582_s10 = inlined_call_operand.vmem [shape: f32[16,32], index: 10, kind: output, shape index: {1}]   ;;  %s583_s8 = inlined_call_operand.vmem [shape: f32[1,32], index: 8, kind: input, shape index: {}]   ;;  %s584_s11 = inlined_call_operand.vmem [shape: f32[16,32], index: 11, kind: output, shape index: {2}]  }
   0x1   :  { %v37_v0 = vld [vmem:[%s573_s3] sm:$0xff]  ;;  %v38_v1 = vld [vmem:[%s573_s3 + $0x8] sm:$0xff]  ;;  %v39_v2 = vld [vmem:[%s573_s3 + $0x10] sm:$0xff] }
   0x2   :  { %v396_v3 = vpack.c.bf16 %v38_v1, %v37_v0  ;;  %v40_v4 = vld [vmem:[%s573_s3 + $0x18] sm:$0xff]  ;;  %v35_v5 = vld [vmem:[%s574_s0] sm:$0xff]  ;;  %v135_v8 = vld [vmem:[%s575_s4 + $0x8] sm:$0xff] }
   0x3   :  { %v400_v6 = vpack.c.bf16 %v40_v4, %v39_v2  ;;  %371 = vmatprep.mubr.msk.f32.mxu0 %vm48_vm0, %v35_v5  ;;  %v134_v7 = vld [vmem:[%s575_s4] sm:$0xff]  ;;  %v231_v11 = vld [vmem:[%s576_s5 + $0x8] sm:$0xff]  ;;  %v136_v12 = vld [vmem:[%s575_s4 + $0x10] sm:$0xff] }
   0x4   :  { %v230_v9 = vld [vmem:[%s576_s5] sm:$0xff]  ;;  %397 = vmatprep.subr.bf16.mxu0 %v396_v3  ;;  %v404_v10 = vpack.c.bf16 %v135_v8, %v134_v7  ;;  %v137_v13 = vld [vmem:[%s575_s4 + $0x18] sm:$0xff]  ;;  %v232_v17 = vld [vmem:[%s576_s5 + $0x10] sm:$0xff] }
   0x5   :  { %399 = vmatpush3.bf16.msra.mxu0 %v396_v3  ;;  %v408_v14 = vpack.c.bf16 %v137_v13, %v136_v12  ;;  %v132_v15 = vld [vmem:[%s577_s1] sm:$0xff]  ;;  %v412_v16 = vpack.c.bf16 %v231_v11, %v230_v9  ;;  %v233_v18 = vld [vmem:[%s576_s5 + $0x18] sm:$0xff]  ;;  %v36_v19 = vld [vmem:[%s574_s0 + $0x8] sm:$0xff] }
   0x6   :  { %401 = vmatprep.subr.bf16.mxu0 %v400_v6  ;;  %405 = vmatprep.subr.bf16.mxu1 %v404_v10  ;;  %v416_v20 = vpack.c.bf16 %v233_v18, %v232_v17  ;;  %v228_v21 = vld [vmem:[%s578_s2] sm:$0xff]  ;;  %v133_v22 = vld [vmem:[%s577_s1 + $0x8] sm:$0xff] }
   0x7   :  { %407 = vmatpush3.bf16.msra.mxu1 %v404_v10  ;;  %382 = vmatprep.mubr.msk.f32.mxu1 %vm48_vm0, %v132_v15  ;;  %v229_v23 = vld [vmem:[%s578_s2 + $0x8] sm:$0xff]  ;;  %v336_v24 = vld [vmem:[%s579_s6] ss:$0 sm:$0xff] }
   0x8   :  { %409 = vmatprep.subr.bf16.mxu1 %v408_v14  ;;  %v339_v26 = vld [vmem:[%s580_s7] ss:$0 sm:$0xff] }
   0x9   :  { %403 = vmatpush3.bf16.msra.mxu0 %v400_v6  ;;  %v342_v34 = vld [vmem:[%s583_s8] ss:$0 sm:$0xff] }
   0xa   :  { %413 = vmatprep.subr.bf16.mxu0 %v412_v16 }
   0xb   :  { %411 = vmatpush3.bf16.msra.mxu1 %v408_v14 }
   0xc   :  { %372 = vmatmul.mubr.msk.f32.vlgmr.msra.gmra.mrb[0].mxu0 %vm48_vm0, %v36_v19 }
   0xd   :  { %415 = vmatpush3.bf16.msra.mxu0 %v412_v16  ;;  %393 = vmatprep.mubr.msk.f32.mxu0 %vm48_vm0, %v228_v21 }
   0xe   :  { %417 = vmatprep.subr.bf16.mxu0 %v416_v20  ;;  %383 = vmatmul.mubr.msk.f32.vlgmr.msra.gmra.mrb[0].mxu1 %vm48_vm0, %v133_v22 }
  0x11   :  { %419 = vmatpush3.bf16.msra.mxu0 %v416_v20 }
  0x14   :  { %394 = vmatmul.mubr.msk.f32.vlgmr.msra.gmra.mrb[2].mxu0 %vm48_vm0, %v229_v23 }
  0xdf   :  { %v373_v25 = vpop.f32.mrb[0].mxu0 }
  0xe0   :  { %v127_v27 = vadd.f32 %v373_v25, %v336_v24  ;;  %v121_v28 = vpop.f32.mrb[1].mxu0 }
  0xe1   :  { %v122_v29 = vadd.f32 %v336_v24, %v121_v28  ;;  %v384_v30 = vpop.f32.mrb[0].mxu1 }
  0xe2   :  { %131 = vst.msk [vmem:[%s581_s9 + $0x8] sm:$0xff] %vm48_vm0, %v127_v27  ;;  %v223_v31 = vadd.f32 %v384_v30, %v339_v26  ;;  %v217_v32 = vpop.f32.mrb[1].mxu1 }
  0xe3   :  { %130 = vst.msk [vmem:[%s581_s9] sm:$0xff] %vm48_vm0, %v122_v29  ;;  %v218_v33 = vadd.f32 %v339_v26, %v217_v32 }
  0xe4   :  { %227 = vst.msk [vmem:[%s582_s10 + $0x8] sm:$0xff] %vm48_vm0, %v223_v31 }
  0xe5   :  { %226 = vst.msk [vmem:[%s582_s10] sm:$0xff] %vm48_vm0, %v218_v33 }
  0xe7   :  { %v395_v35 = vpop.f32.mrb[2].mxu0 }
  0xe8   :  { %v319_v36 = vadd.f32 %v395_v35, %v342_v34  ;;  %v313_v37 = vpop.f32.mrb[3].mxu0 }
  0xe9   :  { %v314_v38 = vadd.f32 %v342_v34, %v313_v37 }
  0xea   :  { %323 = vst.msk [vmem:[%s584_s11 + $0x8] sm:$0xff] %vm48_vm0, %v319_v36 }
  0xeb   :  { %322 = vst.msk [vmem:[%s584_s11] sm:$0xff] %vm48_vm0, %v314_v38 }

// kernel: _mha_forward_cross.4
= control target key start
LH: loop header
LB: loop body
LE: loop exit
PB: predicated region body
PF: predicated region fallthrough
CT: control target
= control target key end

     0   :  { %s1506_s15 = smov 0   ;;  %s1508_s16 = smov 0   ;;  %s1702_s0 = inlined_call_operand.vmem [shape: f32[2,8,32], index: 0, kind: input, shape index: {}]   ;;  %s1703_s1 = inlined_call_operand.vmem [shape: f32[2,8,32], index: 1, kind: input, shape index: {}]   ;;  %s1704_s2 = inlined_call_operand.vmem [shape: f32[2,8,32], index: 2, kind: input, shape index: {}]   ;;  %s1705_s3 = inlined_call_operand.vmem [shape: s8[2,1,8,8], index: 3, kind: input, shape index: {}]   ;;  %s1706_s4 = inlined_call_operand.vmem [shape: f32[2,8,32], index: 4, kind: output, shape index: {}]  }
   0x1   :  { %s1510_s17 = smov 0  }
   0x2 LB: > { %s33_s18 = sadd.s32 1, %s1462_s16  ;;  %p1300_p0 = scmp.ge.s32.totalorder %s1466_s17, 1  ;;  %s1466_s17 = sphi %s1510_s17, %s14_s17   ;;  %s1462_s16 = sphi %s1508_s16, %s1710_s16   ;;  %s1458_s15 = sphi %s1506_s15, %s1709_s15  }
   0x3   : > { %p35_p1 = scmp.ge.s32.totalorder %s33_s18, 2  ;;  %p234_p2 = scmp.lt.s32.totalorder %s1466_s17, 3 }
   0x5   : > { %s1712_s18 = smov (%p35_p1, %s33_s18), 0  ;;  %p235_p3 = pnand %p1300_p0, %p234_p2 }
   0x6   : > { %p288_p4 = scmp.lt.s32.totalorder (!%p235_p3), %s1458_s15, 1  ;;  %v1468_v0 = vmov (!%p235_p3), 0.0   ;;  %vm1469_vm0 = vmmov (!%p235_p3), 0   ;;  %vm342_vm1 = vcmask (!%p235_p3), 64512   ;;  %v1470_v3 = vmov (!%p235_p3), 0   ;;  %s1472_s30 = smov (!%p235_p3), 120  }
   0x7   : > { %238 = sbr.rel (%p235_p3) target bundleno = 1438 (0x59e), region = 36  ;;  %1336 = vmatprep.subr.mxu0 (!%p235_p3), %v1468_v0  ;;  %1338 = vmatprep.mubr.msk.f32.mxu0 (!%p235_p3), %vm1469_vm0, %v1468_v0  ;;  %vm332_vm2 = vcmask (!%p235_p3), 31744   ;;  %v1471_v4 = vmov (!%p235_p3), -inf   ;;  %s1473_s5 = smov (!%p235_p3), 112   ;;  %vm446_vm5 = vcmask (!%p235_p3), 7168   ;;  %v1475_v46 = vmov (!%p235_p3), 1  }
   0x8   : > { %1341 = vmatprep.subr.mxu1 (!%p235_p3), %v1468_v0  ;;  %1343 = vmatprep.mubr.msk.f32.mxu1 (!%p235_p3), %vm1469_vm0, %v1468_v0  ;;  %333 = vst.msk [vmem:[#allocation3] sm:$0xff] (!%p235_p3), %vm332_vm2, %v1471_v4  ;;  %334 = vst.msk [vmem:[#allocation4] sm:$0xff] (!%p235_p3), %vm332_vm2, %v1468_v0  ;;  %s1474_s6 = smov (!%p235_p3), 104   ;;  %v1476_v47 = vmov (!%p235_p3), 2   ;;  %vm638_vm6 = vcmask (!%p235_p3), 15368   ;;  %v1477_v53 = vmov (!%p235_p3), 3  }
   0x9   : > { %1413 = vset.pattern.permute.xlu0 (!%p235_p3), %v1470_v3  ;;  %1414 = vset.pattern.permute.xlu1 (!%p235_p3), %v1475_v46  ;;  %vm839_vm7 = vcmask (!%p235_p3), 23568   ;;  %vm1040_vm8 = vcmask (!%p235_p3), 31768   ;;  %vm335_vm9 = vcmask (!%p235_p3), 261120   ;;  %s1478_s10 = smov (!%p235_p3), 8   ;;  %s1479_s11 = smov (!%p235_p3), 16   ;;  %vm729_vm10 = vcmask (!%p235_p3), 130112  }
   0xa   : > { %336 = vst.msk [vmem:[#allocation2] sm:$0xff] (!%p235_p3), %vm335_vm9, %v1468_v0  ;;  %s1480_s12 = smov (!%p235_p3), 24   ;;  %vm930_vm11 = vcmask (!%p235_p3), 195712   ;;  %vm1131_vm12 = vcmask (!%p235_p3), 261312  }
   0xe   : > { %s1714_s15 = smov (!%p288_p4, %s1458_s15), 1 }
   0xf   : > { %s1530_s19 = sshll.u32 %s1714_s15, 3  ;;  %s1304_s26 = sshll.u32 %s1714_s15, 1  ;;  %v1564_v14 = vld [vmem:[#allocation3] sm:$0xff] }
  0x10   : > { %s301_s22 = scalar_lea.vmem %s1703_s1, %s1530_s19  ;;  %s294_s25 = scalar_lea.vmem %s1702_s0, %s1530_s19 }
  0x11   : > { %v340_v1 = vld [vmem:[%s301_s22] sm:$0xff]  ;;  %s318_s29 = scalar_lea.vmem %s1705_s3, %s1304_s26  ;;  %s308_s9 = scalar_lea.vmem %s1704_s2, %s1530_s19 }
  0x12   : > { %1337 = vmatpush3.xpose.msk.msra.mxu0 %vm342_vm1, %v340_v1  ;;  %v339_v2 = vld [vmem:[%s294_s25] sm:$0xff]  ;;  %538 = vrot.lane.b32.xlu1 %v340_v1, %s1472_s30  ;;  %s325_s15 = scalar_lea.vmem %s1706_s4, %s1530_s19 }
  0x13   : > { %1351 = vmatprep.subr.mxu0 %v1468_v0  ;;  %v337_v5 = vld [vmem:[%s318_s29] sm:$0x3] }
  0x14   : > { %vm338_vm3 = vnez %v337_v5  ;;  %v1578_v18 = vld [vmem:[%s308_s9] sm:$0xff] }
  0x15   : > { %1339 = vmatmul.mubr.msk.f32.vlgmr.msra.gmra.mrb[0].mxu0 %vm342_vm1, %v339_v2  ;;  %v420_v6 = vsel %vm338_vm3, 16843009, %v1470_v3  ;;  %1342 = vmatpush3.msra.mxu1 %v1578_v18 }
  0x16   : > { %1353 = vmatprep.mubr.msk.f32.mxu0 %vm1469_vm0, %v1468_v0  ;;  %v421_v7 = vunpack.c.0.s8 %v420_v6  ;;  %535 = vrot.lane.b32.xlu1 %v339_v2, %s1472_s30 }
  0x17   : > { %1346 = vmatprep.subr.mxu1 %v1468_v0 }
  0x18   : > { %vm1551_vm4 = vcmp.ne.s32.totalorder %v421_v7, 0 }
  0x1a   : > { %739 = vrot.lane.b32.xlu1 %v340_v1, %s1473_s5 }
  0x1e   : > { %736 = vrot.lane.b32.xlu1 %v339_v2, %s1473_s5 }
  0x22   : > { %940 = vrot.lane.b32.xlu1 %v340_v1, %s1474_s6 }
  0x26   : > { %937 = vrot.lane.b32.xlu1 %v339_v2, %s1474_s6 }
  0x84   : > { %v539_v19 = vpop.permute.xlu1 %538 }
  0x88   : > { %v536_v23 = vpop.permute.xlu1 %535 }
  0x8c   : > { %v740_v24 = vpop.permute.xlu1 %739 }
  0x90   : > { %v737_v26 = vpop.permute.xlu1 %736 }
  0x94   : > { %v941_v27 = vpop.permute.xlu1 %940 }
  0x98   : > { %v938_v28 = vpop.permute.xlu1 %937 }
  0xe8   : > { %v415_v8 = vpop.f32.mrb[0].mxu0 }
  0xe9   : > { %v419_v10 = vmul.f32 0.35355338, %v415_v8  ;;  %v1340_v11 = vpop.f32.mrb[1].mxu0 }
  0xeb   : > { %v423_v12 = vsel %vm1551_vm4, %v419_v10, -1e+09 }
  0xec   : > { %v425_v13 = vsel %vm342_vm1, %v423_v12, -inf }
  0xed   : > { %426 = vmax.xlane.f32.xlu0 %v425_v13 }
 0x17a   : > { %v427_v15 = vpop.xlane.xlu0 %426 }
 0x17b   : > { %v1567_v16 = vmax.f32 %v1564_v14, %v427_v15 }
 0x17d   : > { %v429_v17 = vsub.f32 %v1564_v14, %v1567_v16  ;;  %530 = vst.msk [vmem:[#allocation3] sm:$0xff] %vm446_vm5, %v1567_v16  ;;  %434 = vperm.xlu0 %1413, %v1567_v16  }
 0x17f   : > { %v430_v62 = vmul.f32 1.442695, %v429_v17 }
 0x181   : > { %1415 = vset.pattern.permute.xlu0 %v1476_v47 }
 0x184   : > { %v1613_v49 = vld [vmem:[#allocation3] sm:$0xff] }
 0x1fc   : > { %v435_v20 = vpop.permute.xlu0 %434 }
 0x1fd   : > { %v437_v21 = vsub.f32 %v423_v12, %v435_v20 }
 0x1ff   : > { %v438_v22 = vmul.f32 1.442695, %v437_v21 }
 0x201   : > { %1426 = vpow2.f32 %v438_v22 }
 0x202   : > { %1428 = vpow2.f32 %v430_v62 }
 0x20b   : > { %v1582_v25 = vpop.eup %1426 }
 0x20c   : > { %1344 = vmatmul.mubr.msk.f32.vlgmr.msra.gmra.mrb[0].mxu1 %vm342_vm1, %v1582_v25  ;;  %v442_v61 = vsel %vm342_vm1, %v1582_v25, 0.0  ;;  %v1429_v63 = vpop.eup %1428 }
 0x20d   : > { %1347 = vmatpush3.xpose.msk.msra.mxu1 %vm342_vm1, %v539_v19  ;;  %1348 = vmatprep.mubr.msk.f32.mxu1 %vm1469_vm0, %v1468_v0 }
 0x20e   : > { %1356 = vmatprep.subr.mxu1 %v1468_v0 }
 0x210   : > { %1349 = vmatmul.mubr.msk.f32.vlgmr.msra.gmra.mrb[2].mxu1 %vm342_vm1, %v536_v23 }
 0x211   : > { %1357 = vmatpush3.xpose.msk.msra.mxu1 %vm342_vm1, %v740_v24  ;;  %1358 = vmatprep.mubr.msk.f32.mxu1 %vm1469_vm0, %v1468_v0 }
 0x212   : > { %1366 = vmatprep.subr.mxu1 %v1468_v0 }
 0x214   : > { %1359 = vmatmul.mubr.msk.f32.vlgmr.msra.gmra.mrb[4].mxu1 %vm342_vm1, %v737_v26 }
 0x215   : > { %1367 = vmatpush3.xpose.msk.msra.mxu1 %vm342_vm1, %v941_v27  ;;  %1368 = vmatprep.mubr.msk.f32.mxu1 %vm1469_vm0, %v1468_v0  ;;  %v448_v27 = vld [vmem:[#allocation2] sm:$0xff] }
 0x218   : > { %1369 = vmatmul.mubr.msk.f32.vlgmr.msra.gmra.mrb[6].mxu1 %vm342_vm1, %v938_v28 }
 0x2df   : > { %v1600_v29 = vpop.f32.mrb[0].mxu1 }
 0x2e0   : > { %v1345_v30 = vpop.f32.mrb[1].mxu1 }
 0x2e3   : > { %v610_v31 = vpop.f32.mrb[2].mxu1 }
 0x2e4   : > { %v614_v32 = vmul.f32 0.35355338, %v610_v31  ;;  %v1350_v33 = vpop.f32.mrb[3].mxu1 }
 0x2e6   : > { %v615_v34 = vsel %vm1551_vm4, %v614_v32, -1e+09 }
 0x2e7   : > { %v617_v35 = vsel %vm342_vm1, %v615_v34, -inf  ;;  %v811_v36 = vpop.f32.mrb[4].mxu1 }
 0x2e8   : > { %618 = vmax.xlane.f32.xlu1 %v617_v35  ;;  %v815_v37 = vmul.f32 0.35355338, %v811_v36  ;;  %v1360_v38 = vpop.f32.mrb[5].mxu1 }
 0x2ea   : > { %v816_v39 = vsel %vm1551_vm4, %v815_v37, -1e+09 }
 0x2eb   : > { %v818_v40 = vsel %vm342_vm1, %v816_v39, -inf  ;;  %v1012_v41 = vpop.f32.mrb[6].mxu1 }
 0x2ec   : > { %819 = vmax.xlane.f32.xlu0 %v818_v40  ;;  %v1016_v42 = vmul.f32 0.35355338, %v1012_v41  ;;  %v1370_v43 = vpop.f32.mrb[7].mxu1 }
 0x2ee   : > { %v1017_v44 = vsel %vm1551_vm4, %v1016_v42, -1e+09 }
 0x2ef   : > { %v1019_v45 = vsel %vm342_vm1, %v1017_v44, -inf }
 0x2f0   : > { %1020 = vmax.xlane.f32.xlu1 %v1019_v45 }
 0x375   : > { %v619_v48 = vpop.xlane.xlu1 %618 }
 0x376   : > { %v1616_v50 = vmax.f32 %v1613_v49, %v619_v48 }
 0x378   : > { %v621_v51 = vsub.f32 %v1613_v49, %v1616_v50  ;;  %731 = vst.msk [vmem:[#allocation3] sm:$0xff] %vm638_vm6, %v1616_v50  ;;  %626 = vperm.xlu1 %1414, %v1616_v50  }
 0x379   : > { %v820_v52 = vpop.xlane.xlu0 %819 }
 0x37a   : > { %v622_v20 = vmul.f32 1.442695, %v621_v51 }
 0x37c   : > { %648 = vrot.lane.b32.xlu1 %v1578_v18, %s1472_s30 }
 0x37d   : > { %1416 = vset.pattern.permute.xlu1 %v1477_v53  ;;  %v1021_v57 = vpop.xlane.xlu1 %1020 }
 0x37f   : > { %v817_v54 = vld [vmem:[#allocation3] sm:$0xff] }
 0x380   : > { %v821_v55 = vmax.f32 %v817_v54, %v820_v52 }
 0x382   : > { %v822_v56 = vsub.f32 %v817_v54, %v821_v55  ;;  %932 = vst.msk [vmem:[#allocation3] sm:$0xff] %vm839_vm7, %v821_v55  ;;  %827 = vperm.xlu0 %1415, %v821_v55  }
 0x384   : > { %v823_v21 = vmul.f32 1.442695, %v822_v56 }
 0x386   : > { %1418 = vset.pattern.permute.xlu0 %v1475_v46 }
 0x389   : > { %v1628_v58 = vld [vmem:[#allocation3] sm:$0xff] }
 0x38a   : > { %v1631_v59 = vmax.f32 %v1628_v58, %v1021_v57 }
 0x38c   : > { %v1023_v60 = vsub.f32 %v1628_v58, %v1631_v59  ;;  %1133 = vst.msk [vmem:[#allocation3] sm:$0xff] %vm1040_vm8, %v1631_v59  ;;  %1028 = vperm.xlu1 %1416, %v1631_v59  }
 0x38e   : > { %v1024_v36 = vmul.f32 1.442695, %v1023_v60 }
 0x390   : > { %849 = vrot.lane.b32.xlu1 %v1578_v18, %s1473_s5 }
 0x391   : > { %1417 = vset.pattern.permute.xlu1 %v1470_v3 }
 0x394   : > { %1050 = vrot.lane.b32.xlu1 %v1578_v18, %s1474_s6 }
 0x3b8   : > { %443 = vadd.xlane.f32.xlu1 %v442_v61 }
 0x3c9   : > { %451 = vperm.xlu1 %1417, %v1429_v63  }
 0x3cd   : > { %1420 = vset.pattern.permute.xlu1 %v1477_v53 }
 0x3f7   : > { %v627_v1 = vpop.permute.xlu1 %626 }
 0x3f8   : > { %v629_v2 = vsub.f32 %v615_v34, %v627_v1 }
 0x3fa   : > { %v630_v4 = vmul.f32 1.442695, %v629_v2 }
 0x3fb   : > { %v649_v5 = vpop.permute.xlu1 %648 }
 0x3fc   : > { %1430 = vpow2.f32 %v630_v4  ;;  %1352 = vmatpush3.msra.mxu0 %v649_v5 }
 0x3fd   : > { %1361 = vmatprep.subr.mxu0 %v1468_v0 }
 0x401   : > { %v828_v6 = vpop.permute.xlu0 %827 }
 0x402   : > { %v830_v7 = vsub.f32 %v816_v39, %v828_v6 }
 0x404   : > { %v831_v8 = vmul.f32 1.442695, %v830_v7 }
 0x406   : > { %v1431_v9 = vpop.eup %1430  ;;  %1432 = vpow2.f32 %v831_v8 }
 0x407   : > { %1354 = vmatmul.mubr.msk.f32.vlgmr.msra.gmra.mrb[2].mxu0 %vm342_vm1, %v1431_v9  ;;  %v634_v10 = vsel %vm342_vm1, %v1431_v9, 0.0 }
 0x408   : > { %635 = vadd.xlane.f32.xlu0 %v634_v10  ;;  %1363 = vmatprep.mubr.msk.f32.mxu0 %vm1469_vm0, %v1468_v0 }
 0x40b   : > { %v1029_v11 = vpop.permute.xlu1 %1028 }
 0x40c   : > { %v1031_v12 = vsub.f32 %v1017_v44, %v1029_v11 }
 0x40e   : > { %v1032_v13 = vmul.f32 1.442695, %v1031_v12 }
 0x40f   : > { %v850_v14 = vpop.permute.xlu1 %849 }
 0x410   : > { %v1433_v15 = vpop.eup %1432  ;;  %1434 = vpow2.f32 %v1032_v13  ;;  %1362 = vmatpush3.msra.mxu0 %v850_v14 }
 0x411   : > { %1364 = vmatmul.mubr.msk.f32.vlgmr.msra.gmra.mrb[4].mxu0 %vm342_vm1, %v1433_v15  ;;  %v835_v16 = vsel %vm342_vm1, %v1433_v15, 0.0  ;;  %1371 = vmatprep.subr.mxu0 %v1468_v0  ;;  %1436 = vpow2.f32 %v622_v20 }
 0x412   : > { %836 = vadd.xlane.f32.xlu1 %v835_v16  ;;  %1373 = vmatprep.mubr.msk.f32.mxu0 %vm1469_vm0, %v1468_v0  ;;  %1438 = vpow2.f32 %v823_v21  ;;  %v440_v0 = vld [vmem:[#allocation4] sm:$0xff] }
 0x413   : > { %v1051_v17 = vpop.permute.xlu1 %1050  ;;  %v441_v24 = vmul.f32 %v1429_v63, %v440_v0  ;;  %1440 = vpow2.f32 %v1024_v36 }
 0x414   : > { %1372 = vmatpush3.msra.mxu0 %v1051_v17 }
 0x41a   : > { %v1435_v18 = vpop.eup %1434 }
 0x41b   : > { %1374 = vmatmul.mubr.msk.f32.vlgmr.msra.gmra.mrb[6].mxu0 %vm342_vm1, %v1435_v18  ;;  %v1036_v19 = vsel %vm342_vm1, %v1435_v18, 0.0  ;;  %v1437_v22 = vpop.eup %1436 }
 0x41c   : > { %1037 = vadd.xlane.f32.xlu0 %v1036_v19  ;;  %v1439_v23 = vpop.eup %1438 }
 0x432   : > { %643 = vperm.xlu0 %1418, %v1437_v22  }
 0x436   : > { %1419 = vset.pattern.permute.xlu0 %v1476_v47 }
 0x437   : > { %844 = vperm.xlu0 %1419, %v1439_v23  }
 0x43b   : > { %1422 = vset.pattern.permute.xlu0 %v1475_v46 }
 0x445   : > { %v444_v25 = vpop.xlane.xlu1 %443 }
 0x446   : > { %v445_v26 = vadd.f32 %v444_v25, %v441_v24 }
 0x448   : > { %447 = vst.msk [vmem:[#allocation4] sm:$0xff] %vm446_vm5, %v445_v26 }
 0x449   : > { %v452_v28 = vpop.permute.xlu1 %451 }
 0x44a   : > { %v454_v30 = vmul.f32 %v452_v28, %v448_v27 }
 0x44c   : > { %v528_v31 = vadd.f32 %v1600_v29, %v454_v30  ;;  %v1441_v29 = vpop.eup %1440 }
 0x44e   : > { %529 = vst.msk [vmem:[#allocation2] sm:$0xff] %vm342_vm1, %v528_v31 }
 0x44f   : > { %v632_v32 = vld [vmem:[#allocation4] sm:$0xff] }
 0x450   : > { %v633_v33 = vmul.f32 %v1437_v22, %v632_v32 }
 0x455   : > { %v640_v56 = vld [vmem:[#allocation2] sm:$0xff] }
 0x495   : > { %v636_v34 = vpop.xlane.xlu0 %635 }
 0x496   : > { %v637_v35 = vadd.f32 %v636_v34, %v633_v33 }
 0x498   : > { %639 = vst.msk [vmem:[#allocation4] sm:$0xff] %vm638_vm6, %v637_v35 }
 0x49f   : > { %v833_v37 = vld [vmem:[#allocation4] sm:$0xff]  ;;  %v837_v39 = vpop.xlane.xlu1 %836 }
 0x4a0   : > { %v834_v38 = vmul.f32 %v1439_v23, %v833_v37 }
 0x4a2   : > { %v838_v40 = vadd.f32 %v837_v39, %v834_v38 }
 0x4a4   : > { %840 = vst.msk [vmem:[#allocation4] sm:$0xff] %vm839_vm7, %v838_v40 }
 0x4a9   : > { %v1038_v43 = vpop.xlane.xlu0 %1037 }
 0x4ab   : > { %v1034_v41 = vld [vmem:[#allocation4] sm:$0xff] }
 0x4ac   : > { %v1035_v42 = vmul.f32 %v1441_v29, %v1034_v41 }
 0x4ae   : > { %v1039_v44 = vadd.f32 %v1038_v43, %v1035_v42 }
 0x4b0   : > { %1041 = vst.msk [vmem:[#allocation4] sm:$0xff] %vm1040_vm8, %v1039_v44 }
 0x4b1   : > { %v644_v55 = vpop.permute.xlu0 %643 }
 0x4b2   : > { %v646_v57 = vmul.f32 %v644_v55, %v640_v56 }
 0x4b6   : > { %v845_v59 = vpop.permute.xlu0 %844 }
 0x4b7   : > { %v1137_v48 = vld [vmem:[#allocation4] sm:$0xff] }
 0x4b8   : > { %1442 = vrcp.f32 %v1137_v48 }
 0x4c2   : > { %v1443_v51 = vpop.eup %1442 }
 0x4da   : > { %v720_v45 = vpop.f32.mrb[2].mxu0 }
 0x4db   : > { %725 = vrot.lane.b32.xlu1 %v720_v45, %s1478_s10  ;;  %v1355_v46 = vpop.f32.mrb[3].mxu0 }
 0x4e4   : > { %v921_v49 = vpop.f32.mrb[4].mxu0 }
 0x4e5   : > { %926 = vrot.lane.b32.xlu1 %v921_v49, %s1479_s11  ;;  %v1365_v50 = vpop.f32.mrb[5].mxu0 }
 0x4e9   : > { %1045 = vperm.xlu1 %1420, %v1441_v29  }
 0x4ed   : > { %1421 = vset.pattern.permute.xlu1 %v1470_v3 }
 0x4ee   : > { %1142 = vperm.xlu1 %1421, %v1443_v51   ;;  %v1122_v52 = vpop.f32.mrb[6].mxu0 }
 0x4ef   : > { %1127 = vrot.lane.b32.xlu0 %v1122_v52, %s1480_s12  ;;  %v1375_v54 = vpop.f32.mrb[7].mxu0 }
 0x4f2   : > { %1423 = vset.pattern.permute.xlu1 %v1476_v47 }
 0x4f3   : > { %1156 = vperm.xlu1 %1423, %v1443_v51   ;;  %1149 = vperm.xlu0 %1422, %v1443_v51  }
 0x4f7   : > { %1424 = vset.pattern.permute.xlu1 %v1477_v53  ;;  %1425 = vset.pattern.permute.xlu0 %v1477_v53 }
 0x4f8   : > { %1163 = vperm.xlu1 %1424, %v1443_v51  }
 0x54d   : > { %v726_v58 = vpop.permute.xlu1 %725 }
 0x54e   : > { %v728_v3 = vadd.f32 %v726_v58, %v646_v57 }
 0x550   : > { %730 = vst.msk [vmem:[#allocation2] sm:$0xff] %vm729_vm10, %v728_v3 }
 0x557   : > { %v841_v60 = vld [vmem:[#allocation2] sm:$0xff]  ;;  %v927_v47 = vpop.permute.xlu1 %926 }
 0x558   : > { %v847_v61 = vmul.f32 %v845_v59, %v841_v60 }
 0x55a   : > { %v929_v62 = vadd.f32 %v927_v47, %v847_v61 }
 0x55c   : > { %931 = vst.msk [vmem:[#allocation2] sm:$0xff] %vm930_vm11, %v929_v62 }
 0x561   : > { %v1128_v2 = vpop.permute.xlu0 %1127 }
 0x563   : > { %v1042_v63 = vld [vmem:[#allocation2] sm:$0xff] }
 0x568   : > { %v1046_v1 = vpop.permute.xlu1 %1045 }
 0x569   : > { %v1048_v53 = vmul.f32 %v1046_v1, %v1042_v63 }
 0x56b   : > { %v1130_v4 = vadd.f32 %v1128_v2, %v1048_v53 }
 0x56d   : > { %1132 = vst.msk [vmem:[#allocation2] sm:$0xff] %vm1131_vm12, %v1130_v4  ;;  %v1143_v5 = vpop.permute.xlu1 %1142 }
 0x572   : > { %v1150_v9 = vpop.permute.xlu0 %1149  ;;  %v1157_v11 = vpop.permute.xlu1 %1156 }
 0x574   : > { %v1139_v6 = vld [vmem:[#allocation2] sm:$0xff] }
 0x575   : > { %v1145_v7 = vmul.f32 %v1143_v5, %v1139_v6 }
 0x577   : > { %1146 = vst.msk [vmem:[#allocation2] sm:$0xff] %vm342_vm1, %v1145_v7  ;;  %v1164_v14 = vpop.permute.xlu1 %1163 }
 0x57e   : > { %v1147_v8 = vld [vmem:[#allocation2] sm:$0xff] }
 0x57f   : > { %v1152_v10 = vmul.f32 %v1150_v9, %v1147_v8 }
 0x581   : > { %1153 = vst.msk [vmem:[#allocation2] sm:$0xff] %vm729_vm10, %v1152_v10 }
 0x588   : > { %v1154_v12 = vld [vmem:[#allocation2] sm:$0xff] }
 0x589   : > { %v1159_v13 = vmul.f32 %v1157_v11, %v1154_v12 }
 0x58b   : > { %1160 = vst.msk [vmem:[#allocation2] sm:$0xff] %vm930_vm11, %v1159_v13 }
 0x592   : > { %v1161_v15 = vld [vmem:[#allocation2] sm:$0xff] }
 0x593   : > { %v1166_v16 = vmul.f32 %v1164_v14, %v1161_v15 }
 0x595   : > { %1167 = vst.msk [vmem:[#allocation2] sm:$0xff] %vm1131_vm12, %v1166_v16 }
 0x59c   : > { %v1168_v17 = vld [vmem:[#allocation2] sm:$0xff] }
 0x59d   : > { %1170 = vst.msk [vmem:[%s325_s15] sm:$0xff] %vm335_vm9, %v1168_v17 }
 0x59e PF: > { %s14_s17 = sadd.s32 1, %s1466_s17   ;;  %s1709_s15 = smov %s1462_s16 }
 0x59f   : > { %p11_p5 = scmp.ge.s32.totalorder %s14_s17, 4   ;;  %s1710_s16 = smov %s1712_s18 }
 0x5a1   :  { %13 = sbr.rel (!%p11_p5) target bundleno = 2 (0x2), region = 83 }

</bundles_post_ra>
